<compile_context>
chip_gen: v7x
topology: tpu7x:2x2x1
jax: 0.10.0
libtpu: 0.0.40
codegen_flags: <defaults>
</compile_context>

<pallas_src>
import functools
import math

import jax
import jax.numpy as jnp
from jax.experimental import pallas as pl
from jax.experimental.pallas import tpu as pltpu


# -----------------------------------------------------------------------------
# pltpu.roll direction probe (run once; tiny kernel)
# -----------------------------------------------------------------------------
@functools.lru_cache(maxsize=None)
def _pltpu_roll_like_jnp():
    """True  -> pltpu.roll(x, s, axis) behaves like jnp.roll (data -> higher idx).
    False -> positive shift moves data to lower indices.
    None  -> pltpu.roll unusable here; caller falls back to slice+concat."""
    try:
        def probe_kernel(x_ref, o_ref):
            o_ref[...] = pltpu.roll(x_ref[...], 1, axis=1)

        x = jax.lax.broadcasted_iota(jnp.int32, (8, 128), 1)
        y = pl.pallas_call(
            probe_kernel,
            out_shape=jax.ShapeDtypeStruct((8, 128), jnp.int32),
        )(x)
        first = int(y[0, 0])
        if first == 127:      # out[0] == in[-1]  -> jnp.roll convention
            return True
        if first == 1:        # out[i] == in[i+1] -> opposite convention
            return False
        return None
    except Exception:
        return None


def _make_roll_left(n_lanes):
    """roll_left(a, k): out[:, p] = a[:, (p + k) % n_lanes] along the lane axis."""
    like_jnp = _pltpu_roll_like_jnp()

    def roll_left(a, k):
        if k == 0:
            return a
        if like_jnp is None:                      # fallback: slice + concat
            return jnp.concatenate([a[:, k:], a[:, :k]], axis=1)
        shift = (n_lanes - k) if like_jnp else k  # non-negative shift either way
        return pltpu.roll(a, shift, axis=1)

    return roll_left


# -----------------------------------------------------------------------------
# Fused kernel: conv towers + pools + concat + projection for one batch block
# -----------------------------------------------------------------------------
def _fused_kernel(x_ref, *refs, widths, num_layers, pool, L, roll_left):
    """x_ref : (1, E, BB*L) f32  -- embedded tokens, batch packed into lanes.
    refs  : w0 (nb*F, max_w*E), b0 (nb*F, 1),
            then per branch, per layer >= 1: W (F, width*F), b (F, 1),
            then proj_w (C, nb*F), proj_b (C, 1), out (1, C, BB).

    All rolls shift data toward lower lane indices, so lanes polluted by a
    wrap / cross-sample read are exactly the positions that are already
    invalid for a "valid" conv/pool; the adaptive-max epilogue masks them.
    """
    nb = len(widths)
    max_w = max(widths)
    w0_ref, b0_ref = refs[0], refs[1]
    conv_refs = refs[2:-3]
    pw_ref, pb_ref, out_ref = refs[-3], refs[-2], refs[-1]

    x = x_ref[0]                                   # (E, BL) f32
    BL = x.shape[1]
    BB = BL // L
    F = b0_ref.shape[0] // nb

    def im2col(inp, width):
        # tap-major rows: rows [k*Cin:(k+1)*Cin] hold inp shifted left by k.
        return jnp.concatenate([roll_left(inp, k) for k in range(width)], axis=0)

    def maxpool(inp):                              # MaxPool1d(pool, stride=1)
        y = inp
        for k in range(1, pool):
            y = jnp.maximum(y, roll_left(inp, k))
        return y

    # ---- layer 0, shared across branches: ONE stacked MXU matmul ------------
    u0 = im2col(x, max_w)                          # (max_w*E, BL)
    h0 = jnp.dot(w0_ref[...], u0, preferred_element_type=jnp.float32)
    h0 = jnp.maximum(h0 + b0_ref[...], 0.0)        # (nb*F, BL), bias + ReLU

    per_branch = 2 * (num_layers - 1)
    feats = []
    for bidx, width in enumerate(widths):
        h = h0[bidx * F:(bidx + 1) * F]            # (F, BL)
        lvalid = L - width + 1
        branch_refs = conv_refs[bidx * per_branch:(bidx + 1) * per_branch]

        for layer in range(1, num_layers):
            h = maxpool(h)                         # pool after previous ReLU
            lvalid -= pool - 1
            w_ref = branch_refs[2 * (layer - 1)]
            b_ref = branch_refs[2 * (layer - 1) + 1]
            u = im2col(h, width)                   # (width*F, BL)
            h = jnp.maximum(
                jnp.dot(w_ref[...], u, preferred_element_type=jnp.float32)
                + b_ref[...], 0.0)
            lvalid -= width - 1

        # AdaptiveMaxPool1d(1): per-sample max over the lvalid valid positions.
        h3 = h.reshape(F, BB, L)
        pos = jax.lax.broadcasted_iota(jnp.int32, (1, 1, L), 2)
        hm = jnp.where(pos < lvalid, h3, 0.0)      # post-ReLU values are >= 0
        feats.append(jnp.max(hm, axis=-1))         # (F, BB)

    feats = jnp.concatenate(feats, axis=0)         # (nb*F, BB)
    logits = jnp.dot(pw_ref[...], feats,
                     preferred_element_type=jnp.float32) + pb_ref[...]
    out_ref[0] = logits                            # (C, BB)


# -----------------------------------------------------------------------------
# Wrapper
# -----------------------------------------------------------------------------
def _pick_batch_block(batch, seq_len, lane_target=512):
    """Batch-block size bb: pack bb*seq_len positions into the lane axis.

    Aims for bb*seq_len ~ lane_target (and a multiple of 128 when that does not
    force excessive padding) so matmul N-dims, vreg ops and the output store
    are lane-dense.  The batch is zero-padded up to a multiple of bb.
    """
    base = 128 // math.gcd(seq_len, 128)           # smallest bb with bb*L % 128 == 0
    if base * seq_len > max(lane_target, 128):     # would over-pad: drop the 128-multiple
        base = 1
    cap = max(base, (lane_target // (base * seq_len)) * base)
    need = -(-batch // base) * base                # batch rounded up to multiple of base
    return max(base, min(cap, need))


def _const_spec(shape):
    """BlockSpec for an operand whose block index never changes across the grid:
    single-buffer it so Pallas doesn't waste VMEM double-buffering constants."""
    ndim = len(shape)
    index_map = lambda i: (0,) * ndim
    try:
        return pl.BlockSpec(shape, index_map, pipeline_mode=pl.Buffered(1))
    except Exception:  # older API without pipeline_mode / Buffered
        return pl.BlockSpec(shape, index_map)


def forward(params, data, *, filter_widths, pool, lane_target=512):
    """data: (B, L) int token ids -> (B, num_classes) f32 logits."""
    B, L = data.shape
    V, E = params["embedding"].shape
    F = params["branches"][0][0][0].shape[0]
    num_layers = len(params["branches"][0])
    C = params["proj_w"].shape[0]
    max_w = max(filter_widths)

    min_len = num_layers * (max_w - 1) + (num_layers - 1) * (pool - 1) + 1
    assert L >= min_len, f"sequence length {L} too short (needs >= {min_len})"

    bb = _pick_batch_block(B, L, lane_target)
    nblk = -(-B // bb)          # NOTE: with batches big enough for nblk >= 2, the
    Bp = nblk * bb              # "parallel" grid axis shards across v7x's two TCs.
    BL = bb * L

    # ---- embedding lookup: real gather (native XLA gather), lane-packed ------
    # TODO(synk): fully fused variant = scalar-prefetch ids + DMA rows from an
    #             HBM-resident table (memory_space=pl.ANY) inside the kernel.
    ids = data.astype(jnp.int32)
    if Bp > B:
        ids = jnp.concatenate([ids, jnp.zeros((Bp - B, L), jnp.int32)], axis=0)
    emb = params["embedding"].astype(jnp.float32)
    x = jnp.take(emb, ids, axis=0)                                  # (Bp, L, E)
    x = x.reshape(nblk, bb, L, E).transpose(0, 3, 1, 2).reshape(nblk, E, BL)

    # ---- layout-only parameter prep (constant-folded under jit) --------------
    w0_parts, b0_parts = [], []
    for width, layers in zip(filter_widths, params["branches"]):
        W0, bv = layers[0]                                          # (F, E, w), (F,)
        Wk = jnp.transpose(W0, (0, 2, 1)).reshape(F, width * E)     # tap-major cols
        if width < max_w:
            Wk = jnp.pad(Wk, ((0, 0), (0, (max_w - width) * E)))    # zero-pad K
        w0_parts.append(Wk)
        b0_parts.append(bv.reshape(F, 1))
    w0 = jnp.concatenate(w0_parts, axis=0).astype(jnp.float32)      # (nb*F, max_w*E)
    b0 = jnp.concatenate(b0_parts, axis=0).astype(jnp.float32)      # (nb*F, 1)

    conv_args = []
    for width, layers in zip(filter_widths, params["branches"]):
        for (W, bv) in layers[1:]:
            cin = W.shape[1]
            conv_args.append(jnp.transpose(W, (0, 2, 1))
                             .reshape(F, width * cin).astype(jnp.float32))
            conv_args.append(bv.reshape(F, 1).astype(jnp.float32))
    pw = params["proj_w"].astype(jnp.float32)                       # (C, nb*F)
    pb = params["proj_b"].reshape(C, 1).astype(jnp.float32)

    kernel = functools.partial(
        _fused_kernel, widths=tuple(filter_widths), num_layers=num_layers,
        pool=pool, L=L, roll_left=_make_roll_left(BL))

    in_specs = [pl.BlockSpec((1, E, BL), lambda i: (i, 0, 0)),
                _const_spec(w0.shape), _const_spec(b0.shape)]
    in_specs += [_const_spec(a.shape) for a in conv_args]
    in_specs += [_const_spec(pw.shape), _const_spec(pb.shape)]

    out = pl.pallas_call(
        kernel,
        out_shape=jax.ShapeDtypeStruct((nblk, C, bb), jnp.float32),
        grid=(nblk,),
        in_specs=in_specs,
        out_specs=pl.BlockSpec((1, C, bb), lambda i: (i, 0, 0)),
        compiler_params=pltpu.CompilerParams(
            dimension_semantics=("parallel",)),
    )(x, w0, b0, *conv_args, pw, pb)

    # (nblk, C, bb) -> (Bp, C) -> drop padded rows.
    logits = jnp.transpose(out, (0, 2, 1)).reshape(Bp, C)
    return logits[:B]


# -----------------------------------------------------------------------------
# Parameter init (xavier_uniform weights like the PyTorch module)
# -----------------------------------------------------------------------------
def _xavier_uniform(key, shape, fan_in, fan_out):
    bound = math.sqrt(6.0 / (fan_in + fan_out))
    return jax.random.uniform(key, shape, jnp.float32, -bound, bound)


def init_params(key, *, vocab, emb_dim, num_filters, filter_widths,
                num_conv_layers, num_classes):
    params = {}
    key, k_emb = jax.random.split(key)
    params["embedding"] = jax.random.normal(k_emb, (vocab, emb_dim), jnp.float32)

    branches = []
    for w in filter_widths:
        layers = []
        for layer in range(num_conv_layers):
            cin = emb_dim if layer == 0 else num_filters
            key, kw, kb = jax.random.split(key, 3)
            fan_in, fan_out = cin * w, num_filters * w
            W = _xavier_uniform(kw, (num_filters, cin, w), fan_in, fan_out)
            bbnd = 1.0 / math.sqrt(fan_in)
            bvec = jax.random.uniform(kb, (num_filters,), jnp.float32, -bbnd, bbnd)
            layers.append((W, bvec))
        branches.append(layers)
    params["branches"] = branches

    key, kw, kb = jax.random.split(key, 3)
    in_feat = num_filters * len(filter_widths)
    params["proj_w"] = _xavier_uniform(kw, (num_classes, in_feat),
                                       in_feat, num_classes)
    bbnd = 1.0 / math.sqrt(in_feat)
    params["proj_b"] = jax.random.uniform(kb, (num_classes,), jnp.float32,
                                          -bbnd, bbnd)
    return params


# -----------------------------------------------------------------------------
# Pure-JAX reference (mirrors the PyTorch forward, all f32)
# -----------------------------------------------------------------------------
def reference_forward(params, data, *, filter_widths, pool):
    table = params["embedding"]
    x = jnp.transpose(jnp.take(table, data, axis=0), (0, 2, 1))      # (B, E, L)
    feats = []
    for width, layers in zip(filter_widths, params["branches"]):
        h = x
        for li, (W, b) in enumerate(layers):
            lout = h.shape[-1] - width + 1
            acc = jnp.zeros((h.shape[0], W.shape[0], lout), jnp.float32)
            for k in range(width):
                acc = acc + jnp.einsum("fc,bct->bft", W[:, :, k],
                                       h[:, :, k:k + lout])
            h = jax.nn.relu(acc + b[None, :, None])
            if li < len(layers) - 1:
                lp = h.shape[-1] - pool + 1                           # MaxPool1d(pool, 1)
                h = jnp.max(jnp.stack([h[:, :, k:k + lp] for k in range(pool)], 0), 0)
            else:
                h = jnp.max(h, axis=-1)                               # AdaptiveMaxPool1d(1)
        feats.append(h)
    feats = jnp.concatenate(feats, axis=1)                            # (B, nb*F)
    return feats @ params["proj_w"].T + params["proj_b"][None, :]


if __name__ == "__main__":
    VOCAB = 50
    EMB_DIM = 32          # emb_output_dim
    NUM_FILTERS = 16
    FILTER_WIDTHS = (3, 4)
    NUM_CONV_LAYERS = 3
    POOL = 3              # intermediate_pool_size
    NUM_CLASSES = 2
    B, L = 2, 16          # L >= 14 keeps the width-4 tower valid

    key = jax.random.PRNGKey(0)
    key, k_data = jax.random.split(key)
    data = jax.random.randint(k_data, (B, L), 0, VOCAB, dtype=jnp.int32)

    params = init_params(key, vocab=VOCAB, emb_dim=EMB_DIM,
                         num_filters=NUM_FILTERS, filter_widths=FILTER_WIDTHS,
                         num_conv_layers=NUM_CONV_LAYERS,
                         num_classes=NUM_CLASSES)

    fwd = jax.jit(functools.partial(forward, filter_widths=FILTER_WIDTHS,
                                    pool=POOL))
    logits = jax.block_until_ready(fwd(params, data))
    assert logits.shape == (B, NUM_CLASSES)

    ref = jax.block_until_ready(
        reference_forward(params, data, filter_widths=FILTER_WIDTHS, pool=POOL))
    max_err = float(jnp.max(jnp.abs(logits - ref)))
    assert max_err < 1e-3, f"kernel/reference mismatch: max|diff|={max_err}"

    print("KERNEL_OK")
</pallas_src>

<mosaic_0001>
module attributes {stable_mosaic.version = 11 : i64} {
  func.func @_fused_kernel(%arg0: i32, %arg1: memref<1x32x128xf32, #tpu.memory_space<vmem>>, %arg2: memref<32x128xf32, #tpu.memory_space<vmem>>, %arg3: memref<32x1xf32, #tpu.memory_space<vmem>>, %arg4: memref<16x48xf32, #tpu.memory_space<vmem>>, %arg5: memref<16x1xf32, #tpu.memory_space<vmem>>, %arg6: memref<16x48xf32, #tpu.memory_space<vmem>>, %arg7: memref<16x1xf32, #tpu.memory_space<vmem>>, %arg8: memref<16x64xf32, #tpu.memory_space<vmem>>, %arg9: memref<16x1xf32, #tpu.memory_space<vmem>>, %arg10: memref<16x64xf32, #tpu.memory_space<vmem>>, %arg11: memref<16x1xf32, #tpu.memory_space<vmem>>, %arg12: memref<2x32xf32, #tpu.memory_space<vmem>>, %arg13: memref<2x1xf32, #tpu.memory_space<vmem>>, %arg14: memref<1x2x8xf32, #tpu.memory_space<vmem>>) attributes {dimension_semantics = [#tpu.dimension_semantics<parallel>], iteration_bounds = array<i64: 1>, scalar_prefetch = 0 : i64, scratch_operands = 0 : i64, tpu.core_type = #tpu.core_type<tc>, window_params = [{transform_indices = @transform_0, window_bounds = array<i64: 1, 32, 128>}, {pipeline_mode = #tpu.pipeline_mode<synchronous>, transform_indices = @transform_1, window_bounds = array<i64: 32, 128>}, {pipeline_mode = #tpu.pipeline_mode<synchronous>, transform_indices = @transform_2, window_bounds = array<i64: 32, 1>}, {pipeline_mode = #tpu.pipeline_mode<synchronous>, transform_indices = @transform_3, window_bounds = array<i64: 16, 48>}, {pipeline_mode = #tpu.pipeline_mode<synchronous>, transform_indices = @transform_4, window_bounds = array<i64: 16, 1>}, {pipeline_mode = #tpu.pipeline_mode<synchronous>, transform_indices = @transform_5, window_bounds = array<i64: 16, 48>}, {pipeline_mode = #tpu.pipeline_mode<synchronous>, transform_indices = @transform_6, window_bounds = array<i64: 16, 1>}, {pipeline_mode = #tpu.pipeline_mode<synchronous>, transform_indices = @transform_7, window_bounds = array<i64: 16, 64>}, {pipeline_mode = #tpu.pipeline_mode<synchronous>, transform_indices = @transform_8, window_bounds = array<i64: 16, 1>}, {pipeline_mode = #tpu.pipeline_mode<synchronous>, transform_indices = @transform_9, window_bounds = array<i64: 16, 64>}, {pipeline_mode = #tpu.pipeline_mode<synchronous>, transform_indices = @transform_10, window_bounds = array<i64: 16, 1>}, {pipeline_mode = #tpu.pipeline_mode<synchronous>, transform_indices = @transform_11, window_bounds = array<i64: 2, 32>}, {pipeline_mode = #tpu.pipeline_mode<synchronous>, transform_indices = @transform_12, window_bounds = array<i64: 2, 1>}, {transform_indices = @transform_13, window_bounds = array<i64: 1, 2, 8>}]} {
    %c0 = arith.constant 0 : index
    %c0_0 = arith.constant 0 : index
    %c0_1 = arith.constant 0 : index
    %0 = vector.load %arg1[%c0, %c0_0, %c0_1] : memref<1x32x128xf32, #tpu.memory_space<vmem>>, vector<1x32x128xf32>
    %1 = vector.shape_cast %0 : vector<1x32x128xf32> to vector<32x128xf32>
    %2 = vector.extract_strided_slice %1 {offsets = [0, 1], sizes = [32, 127], strides = [1, 1]} : vector<32x128xf32> to vector<32x127xf32>
    %3 = vector.extract_strided_slice %1 {offsets = [0, 0], sizes = [32, 1], strides = [1, 1]} : vector<32x128xf32> to vector<32x1xf32>
    %4 = tpu.concatenate %2, %3 in 1 : vector<32x127xf32>, vector<32x1xf32> -> vector<32x128xf32>
    %5 = vector.extract_strided_slice %1 {offsets = [0, 2], sizes = [32, 126], strides = [1, 1]} : vector<32x128xf32> to vector<32x126xf32>
    %6 = vector.extract_strided_slice %1 {offsets = [0, 0], sizes = [32, 2], strides = [1, 1]} : vector<32x128xf32> to vector<32x2xf32>
    %7 = tpu.concatenate %5, %6 in 1 : vector<32x126xf32>, vector<32x2xf32> -> vector<32x128xf32>
    %8 = vector.extract_strided_slice %1 {offsets = [0, 3], sizes = [32, 125], strides = [1, 1]} : vector<32x128xf32> to vector<32x125xf32>
    %9 = vector.extract_strided_slice %1 {offsets = [0, 0], sizes = [32, 3], strides = [1, 1]} : vector<32x128xf32> to vector<32x3xf32>
    %10 = tpu.concatenate %8, %9 in 1 : vector<32x125xf32>, vector<32x3xf32> -> vector<32x128xf32>
    %11 = tpu.concatenate %1, %4, %7, %10 in 0 : vector<32x128xf32>, vector<32x128xf32>, vector<32x128xf32>, vector<32x128xf32> -> vector<128x128xf32>
    %c0_2 = arith.constant 0 : index
    %c0_3 = arith.constant 0 : index
    %12 = vector.load %arg2[%c0_2, %c0_3] : memref<32x128xf32, #tpu.memory_space<vmem>>, vector<32x128xf32>
    %cst = arith.constant dense<0.000000e+00> : vector<32x128xf32>
    %13 = tpu.matmul %12, %11, %cst {dimension_numbers = #tpu.dot_dimension_numbers<[1], [0], [0], [1], [0, 0, 1, 1], [], []>} : vector<32x128xf32>, vector<128x128xf32>, vector<32x128xf32> -> vector<32x128xf32>
    %c0_4 = arith.constant 0 : index
    %c0_5 = arith.constant 0 : index
    %14 = vector.load %arg3[%c0_4, %c0_5] : memref<32x1xf32, #tpu.memory_space<vmem>>, vector<32x1xf32>
    %15 = vector.broadcast %14 : vector<32x1xf32> to vector<32x128xf32>
    %16 = arith.addf %13, %15 : vector<32x128xf32>
    %cst_6 = arith.constant 0.000000e+00 : f32
    %17 = vector.broadcast %cst_6 : f32 to vector<32x128xf32>
    %18 = arith.maximumf %16, %17 : vector<32x128xf32>
    %19 = vector.extract_strided_slice %18 {offsets = [0, 0], sizes = [16, 128], strides = [1, 1]} : vector<32x128xf32> to vector<16x128xf32>
    %20 = vector.extract_strided_slice %19 {offsets = [0, 1], sizes = [16, 127], strides = [1, 1]} : vector<16x128xf32> to vector<16x127xf32>
    %21 = vector.extract_strided_slice %19 {offsets = [0, 0], sizes = [16, 1], strides = [1, 1]} : vector<16x128xf32> to vector<16x1xf32>
    %22 = tpu.concatenate %20, %21 in 1 : vector<16x127xf32>, vector<16x1xf32> -> vector<16x128xf32>
    %23 = arith.maximumf %19, %22 : vector<16x128xf32>
    %24 = vector.extract_strided_slice %19 {offsets = [0, 2], sizes = [16, 126], strides = [1, 1]} : vector<16x128xf32> to vector<16x126xf32>
    %25 = vector.extract_strided_slice %19 {offsets = [0, 0], sizes = [16, 2], strides = [1, 1]} : vector<16x128xf32> to vector<16x2xf32>
    %26 = tpu.concatenate %24, %25 in 1 : vector<16x126xf32>, vector<16x2xf32> -> vector<16x128xf32>
    %27 = arith.maximumf %23, %26 : vector<16x128xf32>
    %28 = vector.extract_strided_slice %27 {offsets = [0, 1], sizes = [16, 127], strides = [1, 1]} : vector<16x128xf32> to vector<16x127xf32>
    %29 = vector.extract_strided_slice %27 {offsets = [0, 0], sizes = [16, 1], strides = [1, 1]} : vector<16x128xf32> to vector<16x1xf32>
    %30 = tpu.concatenate %28, %29 in 1 : vector<16x127xf32>, vector<16x1xf32> -> vector<16x128xf32>
    %31 = vector.extract_strided_slice %27 {offsets = [0, 2], sizes = [16, 126], strides = [1, 1]} : vector<16x128xf32> to vector<16x126xf32>
    %32 = vector.extract_strided_slice %27 {offsets = [0, 0], sizes = [16, 2], strides = [1, 1]} : vector<16x128xf32> to vector<16x2xf32>
    %33 = tpu.concatenate %31, %32 in 1 : vector<16x126xf32>, vector<16x2xf32> -> vector<16x128xf32>
    %34 = tpu.concatenate %27, %30, %33 in 0 : vector<16x128xf32>, vector<16x128xf32>, vector<16x128xf32> -> vector<48x128xf32>
    %c0_7 = arith.constant 0 : index
    %c0_8 = arith.constant 0 : index
    %35 = vector.load %arg4[%c0_7, %c0_8] : memref<16x48xf32, #tpu.memory_space<vmem>>, vector<16x48xf32>
    %cst_9 = arith.constant dense<0.000000e+00> : vector<16x128xf32>
    %36 = tpu.matmul %35, %34, %cst_9 {dimension_numbers = #tpu.dot_dimension_numbers<[1], [0], [0], [1], [0, 0, 1, 1], [], []>} : vector<16x48xf32>, vector<48x128xf32>, vector<16x128xf32> -> vector<16x128xf32>
    %c0_10 = arith.constant 0 : index
    %c0_11 = arith.constant 0 : index
    %37 = vector.load %arg5[%c0_10, %c0_11] : memref<16x1xf32, #tpu.memory_space<vmem>>, vector<16x1xf32>
    %38 = vector.broadcast %37 : vector<16x1xf32> to vector<16x128xf32>
    %39 = arith.addf %36, %38 : vector<16x128xf32>
    %cst_12 = arith.constant 0.000000e+00 : f32
    %40 = vector.broadcast %cst_12 : f32 to vector<16x128xf32>
    %41 = arith.maximumf %39, %40 : vector<16x128xf32>
    %42 = vector.extract_strided_slice %41 {offsets = [0, 1], sizes = [16, 127], strides = [1, 1]} : vector<16x128xf32> to vector<16x127xf32>
    %43 = vector.extract_strided_slice %41 {offsets = [0, 0], sizes = [16, 1], strides = [1, 1]} : vector<16x128xf32> to vector<16x1xf32>
    %44 = tpu.concatenate %42, %43 in 1 : vector<16x127xf32>, vector<16x1xf32> -> vector<16x128xf32>
    %45 = arith.maximumf %41, %44 : vector<16x128xf32>
    %46 = vector.extract_strided_slice %41 {offsets = [0, 2], sizes = [16, 126], strides = [1, 1]} : vector<16x128xf32> to vector<16x126xf32>
    %47 = vector.extract_strided_slice %41 {offsets = [0, 0], sizes = [16, 2], strides = [1, 1]} : vector<16x128xf32> to vector<16x2xf32>
    %48 = tpu.concatenate %46, %47 in 1 : vector<16x126xf32>, vector<16x2xf32> -> vector<16x128xf32>
    %49 = arith.maximumf %45, %48 : vector<16x128xf32>
    %50 = vector.extract_strided_slice %49 {offsets = [0, 1], sizes = [16, 127], strides = [1, 1]} : vector<16x128xf32> to vector<16x127xf32>
    %51 = vector.extract_strided_slice %49 {offsets = [0, 0], sizes = [16, 1], strides = [1, 1]} : vector<16x128xf32> to vector<16x1xf32>
    %52 = tpu.concatenate %50, %51 in 1 : vector<16x127xf32>, vector<16x1xf32> -> vector<16x128xf32>
    %53 = vector.extract_strided_slice %49 {offsets = [0, 2], sizes = [16, 126], strides = [1, 1]} : vector<16x128xf32> to vector<16x126xf32>
    %54 = vector.extract_strided_slice %49 {offsets = [0, 0], sizes = [16, 2], strides = [1, 1]} : vector<16x128xf32> to vector<16x2xf32>
    %55 = tpu.concatenate %53, %54 in 1 : vector<16x126xf32>, vector<16x2xf32> -> vector<16x128xf32>
    %56 = tpu.concatenate %49, %52, %55 in 0 : vector<16x128xf32>, vector<16x128xf32>, vector<16x128xf32> -> vector<48x128xf32>
    %c0_13 = arith.constant 0 : index
    %c0_14 = arith.constant 0 : index
    %57 = vector.load %arg6[%c0_13, %c0_14] : memref<16x48xf32, #tpu.memory_space<vmem>>, vector<16x48xf32>
    %cst_15 = arith.constant dense<0.000000e+00> : vector<16x128xf32>
    %58 = tpu.matmul %57, %56, %cst_15 {dimension_numbers = #tpu.dot_dimension_numbers<[1], [0], [0], [1], [0, 0, 1, 1], [], []>} : vector<16x48xf32>, vector<48x128xf32>, vector<16x128xf32> -> vector<16x128xf32>
    %c0_16 = arith.constant 0 : index
    %c0_17 = arith.constant 0 : index
    %59 = vector.load %arg7[%c0_16, %c0_17] : memref<16x1xf32, #tpu.memory_space<vmem>>, vector<16x1xf32>
    %60 = vector.broadcast %59 : vector<16x1xf32> to vector<16x128xf32>
    %61 = arith.addf %58, %60 : vector<16x128xf32>
    %cst_18 = arith.constant 0.000000e+00 : f32
    %62 = vector.broadcast %cst_18 : f32 to vector<16x128xf32>
    %63 = arith.maximumf %61, %62 : vector<16x128xf32>
    %64 = vector.shape_cast %63 : vector<16x128xf32> to vector<16x8x16xf32>
    %65 = tpu.iota {dimensions = array<i32: 2>} : vector<1x1x16xi32>
    %c6_i32 = arith.constant 6 : i32
    %66 = vector.broadcast %c6_i32 : i32 to vector<1x1x16xi32>
    %67 = arith.cmpi slt, %65, %66 : vector<1x1x16xi32>
    %cst_19 = arith.constant 0.000000e+00 : f32
    %68 = vector.shape_cast %67 : vector<1x1x16xi1> to vector<1x1x16xi1>
    %69 = vector.broadcast %68 : vector<1x1x16xi1> to vector<16x8x16xi1>
    %70 = vector.broadcast %cst_19 : f32 to vector<16x8x16xf32>
    %71 = arith.select %69, %64, %70 : vector<16x8x16xi1>, vector<16x8x16xf32>
    %cst_20 = arith.constant dense<0xFF800000> : vector<16x8xf32>
    %72 = vector.multi_reduction <maximumf>, %71, %cst_20 [2] : vector<16x8x16xf32> to vector<16x8xf32>
    %73 = vector.extract_strided_slice %18 {offsets = [16, 0], sizes = [16, 128], strides = [1, 1]} : vector<32x128xf32> to vector<16x128xf32>
    %74 = vector.extract_strided_slice %73 {offsets = [0, 1], sizes = [16, 127], strides = [1, 1]} : vector<16x128xf32> to vector<16x127xf32>
    %75 = vector.extract_strided_slice %73 {offsets = [0, 0], sizes = [16, 1], strides = [1, 1]} : vector<16x128xf32> to vector<16x1xf32>
    %76 = tpu.concatenate %74, %75 in 1 : vector<16x127xf32>, vector<16x1xf32> -> vector<16x128xf32>
    %77 = arith.maximumf %73, %76 : vector<16x128xf32>
    %78 = vector.extract_strided_slice %73 {offsets = [0, 2], sizes = [16, 126], strides = [1, 1]} : vector<16x128xf32> to vector<16x126xf32>
    %79 = vector.extract_strided_slice %73 {offsets = [0, 0], sizes = [16, 2], strides = [1, 1]} : vector<16x128xf32> to vector<16x2xf32>
    %80 = tpu.concatenate %78, %79 in 1 : vector<16x126xf32>, vector<16x2xf32> -> vector<16x128xf32>
    %81 = arith.maximumf %77, %80 : vector<16x128xf32>
    %82 = vector.extract_strided_slice %81 {offsets = [0, 1], sizes = [16, 127], strides = [1, 1]} : vector<16x128xf32> to vector<16x127xf32>
    %83 = vector.extract_strided_slice %81 {offsets = [0, 0], sizes = [16, 1], strides = [1, 1]} : vector<16x128xf32> to vector<16x1xf32>
    %84 = tpu.concatenate %82, %83 in 1 : vector<16x127xf32>, vector<16x1xf32> -> vector<16x128xf32>
    %85 = vector.extract_strided_slice %81 {offsets = [0, 2], sizes = [16, 126], strides = [1, 1]} : vector<16x128xf32> to vector<16x126xf32>
    %86 = vector.extract_strided_slice %81 {offsets = [0, 0], sizes = [16, 2], strides = [1, 1]} : vector<16x128xf32> to vector<16x2xf32>
    %87 = tpu.concatenate %85, %86 in 1 : vector<16x126xf32>, vector<16x2xf32> -> vector<16x128xf32>
    %88 = vector.extract_strided_slice %81 {offsets = [0, 3], sizes = [16, 125], strides = [1, 1]} : vector<16x128xf32> to vector<16x125xf32>
    %89 = vector.extract_strided_slice %81 {offsets = [0, 0], sizes = [16, 3], strides = [1, 1]} : vector<16x128xf32> to vector<16x3xf32>
    %90 = tpu.concatenate %88, %89 in 1 : vector<16x125xf32>, vector<16x3xf32> -> vector<16x128xf32>
    %91 = tpu.concatenate %81, %84, %87, %90 in 0 : vector<16x128xf32>, vector<16x128xf32>, vector<16x128xf32>, vector<16x128xf32> -> vector<64x128xf32>
    %c0_21 = arith.constant 0 : index
    %c0_22 = arith.constant 0 : index
    %92 = vector.load %arg8[%c0_21, %c0_22] : memref<16x64xf32, #tpu.memory_space<vmem>>, vector<16x64xf32>
    %cst_23 = arith.constant dense<0.000000e+00> : vector<16x128xf32>
    %93 = tpu.matmul %92, %91, %cst_23 {dimension_numbers = #tpu.dot_dimension_numbers<[1], [0], [0], [1], [0, 0, 1, 1], [], []>} : vector<16x64xf32>, vector<64x128xf32>, vector<16x128xf32> -> vector<16x128xf32>
    %c0_24 = arith.constant 0 : index
    %c0_25 = arith.constant 0 : index
    %94 = vector.load %arg9[%c0_24, %c0_25] : memref<16x1xf32, #tpu.memory_space<vmem>>, vector<16x1xf32>
    %95 = vector.broadcast %94 : vector<16x1xf32> to vector<16x128xf32>
    %96 = arith.addf %93, %95 : vector<16x128xf32>
    %cst_26 = arith.constant 0.000000e+00 : f32
    %97 = vector.broadcast %cst_26 : f32 to vector<16x128xf32>
    %98 = arith.maximumf %96, %97 : vector<16x128xf32>
    %99 = vector.extract_strided_slice %98 {offsets = [0, 1], sizes = [16, 127], strides = [1, 1]} : vector<16x128xf32> to vector<16x127xf32>
    %100 = vector.extract_strided_slice %98 {offsets = [0, 0], sizes = [16, 1], strides = [1, 1]} : vector<16x128xf32> to vector<16x1xf32>
    %101 = tpu.concatenate %99, %100 in 1 : vector<16x127xf32>, vector<16x1xf32> -> vector<16x128xf32>
    %102 = arith.maximumf %98, %101 : vector<16x128xf32>
    %103 = vector.extract_strided_slice %98 {offsets = [0, 2], sizes = [16, 126], strides = [1, 1]} : vector<16x128xf32> to vector<16x126xf32>
    %104 = vector.extract_strided_slice %98 {offsets = [0, 0], sizes = [16, 2], strides = [1, 1]} : vector<16x128xf32> to vector<16x2xf32>
    %105 = tpu.concatenate %103, %104 in 1 : vector<16x126xf32>, vector<16x2xf32> -> vector<16x128xf32>
    %106 = arith.maximumf %102, %105 : vector<16x128xf32>
    %107 = vector.extract_strided_slice %106 {offsets = [0, 1], sizes = [16, 127], strides = [1, 1]} : vector<16x128xf32> to vector<16x127xf32>
    %108 = vector.extract_strided_slice %106 {offsets = [0, 0], sizes = [16, 1], strides = [1, 1]} : vector<16x128xf32> to vector<16x1xf32>
    %109 = tpu.concatenate %107, %108 in 1 : vector<16x127xf32>, vector<16x1xf32> -> vector<16x128xf32>
    %110 = vector.extract_strided_slice %106 {offsets = [0, 2], sizes = [16, 126], strides = [1, 1]} : vector<16x128xf32> to vector<16x126xf32>
    %111 = vector.extract_strided_slice %106 {offsets = [0, 0], sizes = [16, 2], strides = [1, 1]} : vector<16x128xf32> to vector<16x2xf32>
    %112 = tpu.concatenate %110, %111 in 1 : vector<16x126xf32>, vector<16x2xf32> -> vector<16x128xf32>
    %113 = vector.extract_strided_slice %106 {offsets = [0, 3], sizes = [16, 125], strides = [1, 1]} : vector<16x128xf32> to vector<16x125xf32>
    %114 = vector.extract_strided_slice %106 {offsets = [0, 0], sizes = [16, 3], strides = [1, 1]} : vector<16x128xf32> to vector<16x3xf32>
    %115 = tpu.concatenate %113, %114 in 1 : vector<16x125xf32>, vector<16x3xf32> -> vector<16x128xf32>
    %116 = tpu.concatenate %106, %109, %112, %115 in 0 : vector<16x128xf32>, vector<16x128xf32>, vector<16x128xf32>, vector<16x128xf32> -> vector<64x128xf32>
    %c0_27 = arith.constant 0 : index
    %c0_28 = arith.constant 0 : index
    %117 = vector.load %arg10[%c0_27, %c0_28] : memref<16x64xf32, #tpu.memory_space<vmem>>, vector<16x64xf32>
    %cst_29 = arith.constant dense<0.000000e+00> : vector<16x128xf32>
    %118 = tpu.matmul %117, %116, %cst_29 {dimension_numbers = #tpu.dot_dimension_numbers<[1], [0], [0], [1], [0, 0, 1, 1], [], []>} : vector<16x64xf32>, vector<64x128xf32>, vector<16x128xf32> -> vector<16x128xf32>
    %c0_30 = arith.constant 0 : index
    %c0_31 = arith.constant 0 : index
    %119 = vector.load %arg11[%c0_30, %c0_31] : memref<16x1xf32, #tpu.memory_space<vmem>>, vector<16x1xf32>
    %120 = vector.broadcast %119 : vector<16x1xf32> to vector<16x128xf32>
    %121 = arith.addf %118, %120 : vector<16x128xf32>
    %cst_32 = arith.constant 0.000000e+00 : f32
    %122 = vector.broadcast %cst_32 : f32 to vector<16x128xf32>
    %123 = arith.maximumf %121, %122 : vector<16x128xf32>
    %124 = vector.shape_cast %123 : vector<16x128xf32> to vector<16x8x16xf32>
    %125 = tpu.iota {dimensions = array<i32: 2>} : vector<1x1x16xi32>
    %c3_i32 = arith.constant 3 : i32
    %126 = vector.broadcast %c3_i32 : i32 to vector<1x1x16xi32>
    %127 = arith.cmpi slt, %125, %126 : vector<1x1x16xi32>
    %cst_33 = arith.constant 0.000000e+00 : f32
    %128 = vector.shape_cast %127 : vector<1x1x16xi1> to vector<1x1x16xi1>
    %129 = vector.broadcast %128 : vector<1x1x16xi1> to vector<16x8x16xi1>
    %130 = vector.broadcast %cst_33 : f32 to vector<16x8x16xf32>
    %131 = arith.select %129, %124, %130 : vector<16x8x16xi1>, vector<16x8x16xf32>
    %cst_34 = arith.constant dense<0xFF800000> : vector<16x8xf32>
    %132 = vector.multi_reduction <maximumf>, %131, %cst_34 [2] : vector<16x8x16xf32> to vector<16x8xf32>
    %133 = tpu.concatenate %72, %132 in 0 : vector<16x8xf32>, vector<16x8xf32> -> vector<32x8xf32>
    %c0_35 = arith.constant 0 : index
    %c0_36 = arith.constant 0 : index
    %134 = vector.load %arg12[%c0_35, %c0_36] : memref<2x32xf32, #tpu.memory_space<vmem>>, vector<2x32xf32>
    %cst_37 = arith.constant dense<0.000000e+00> : vector<2x8xf32>
    %135 = tpu.matmul %134, %133, %cst_37 {dimension_numbers = #tpu.dot_dimension_numbers<[1], [0], [0], [1], [0, 0, 1, 1], [], []>} : vector<2x32xf32>, vector<32x8xf32>, vector<2x8xf32> -> vector<2x8xf32>
    %c0_38 = arith.constant 0 : index
    %c0_39 = arith.constant 0 : index
    %136 = vector.load %arg13[%c0_38, %c0_39] : memref<2x1xf32, #tpu.memory_space<vmem>>, vector<2x1xf32>
    %137 = vector.broadcast %136 : vector<2x1xf32> to vector<2x8xf32>
    %138 = arith.addf %135, %137 : vector<2x8xf32>
    %c0_40 = arith.constant 0 : index
    %c0_41 = arith.constant 0 : index
    %c0_42 = arith.constant 0 : index
    %139 = vector.load %arg14[%c0_40, %c0_41, %c0_42] : memref<1x2x8xf32, #tpu.memory_space<vmem>>, vector<1x2x8xf32>
    %140 = vector.shape_cast %139 : vector<1x2x8xf32> to vector<2x8xf32>
    %141 = vector.shape_cast %138 : vector<2x8xf32> to vector<1x2x8xf32>
    tpu.vector_store %arg14[%c0_40, %c0_41, %c0_42], %141 {strides = array<i32>} : memref<1x2x8xf32, #tpu.memory_space<vmem>>, vector<1x2x8xf32>,
    return
  }
  func.func @transform_0(%arg0: i32) -> (i32, i32, i32) {
    %c0_i32 = arith.constant 0 : i32
    %c0_i32_0 = arith.constant 0 : i32
    %c0_i32_1 = arith.constant 0 : i32
    return %arg0, %c0_i32, %c0_i32_0 : i32, i32, i32
  }
  func.func @transform_1(%arg0: i32) -> (i32, i32) {
    %c0_i32 = arith.constant 0 : i32
    %c0_i32_0 = arith.constant 0 : i32
    %c0_i32_1 = arith.constant 0 : i32
    return %c0_i32, %c0_i32_0 : i32, i32
  }
  func.func @transform_2(%arg0: i32) -> (i32, i32) {
    %c0_i32 = arith.constant 0 : i32
    %c0_i32_0 = arith.constant 0 : i32
    %c0_i32_1 = arith.constant 0 : i32
    return %c0_i32, %c0_i32_0 : i32, i32
  }
  func.func @transform_3(%arg0: i32) -> (i32, i32) {
    %c0_i32 = arith.constant 0 : i32
    %c0_i32_0 = arith.constant 0 : i32
    %c0_i32_1 = arith.constant 0 : i32
    return %c0_i32, %c0_i32_0 : i32, i32
  }
  func.func @transform_4(%arg0: i32) -> (i32, i32) {
    %c0_i32 = arith.constant 0 : i32
    %c0_i32_0 = arith.constant 0 : i32
    %c0_i32_1 = arith.constant 0 : i32
    return %c0_i32, %c0_i32_0 : i32, i32
  }
  func.func @transform_5(%arg0: i32) -> (i32, i32) {
    %c0_i32 = arith.constant 0 : i32
    %c0_i32_0 = arith.constant 0 : i32
    %c0_i32_1 = arith.constant 0 : i32
    return %c0_i32, %c0_i32_0 : i32, i32
  }
  func.func @transform_6(%arg0: i32) -> (i32, i32) {
    %c0_i32 = arith.constant 0 : i32
    %c0_i32_0 = arith.constant 0 : i32
    %c0_i32_1 = arith.constant 0 : i32
    return %c0_i32, %c0_i32_0 : i32, i32
  }
  func.func @transform_7(%arg0: i32) -> (i32, i32) {
    %c0_i32 = arith.constant 0 : i32
    %c0_i32_0 = arith.constant 0 : i32
    %c0_i32_1 = arith.constant 0 : i32
    return %c0_i32, %c0_i32_0 : i32, i32
  }
  func.func @transform_8(%arg0: i32) -> (i32, i32) {
    %c0_i32 = arith.constant 0 : i32
    %c0_i32_0 = arith.constant 0 : i32
    %c0_i32_1 = arith.constant 0 : i32
    return %c0_i32, %c0_i32_0 : i32, i32
  }
  func.func @transform_9(%arg0: i32) -> (i32, i32) {
    %c0_i32 = arith.constant 0 : i32
    %c0_i32_0 = arith.constant 0 : i32
    %c0_i32_1 = arith.constant 0 : i32
    return %c0_i32, %c0_i32_0 : i32, i32
  }
  func.func @transform_10(%arg0: i32) -> (i32, i32) {
    %c0_i32 = arith.constant 0 : i32
    %c0_i32_0 = arith.constant 0 : i32
    %c0_i32_1 = arith.constant 0 : i32
    return %c0_i32, %c0_i32_0 : i32, i32
  }
  func.func @transform_11(%arg0: i32) -> (i32, i32) {
    %c0_i32 = arith.constant 0 : i32
    %c0_i32_0 = arith.constant 0 : i32
    %c0_i32_1 = arith.constant 0 : i32
    return %c0_i32, %c0_i32_0 : i32, i32
  }
  func.func @transform_12(%arg0: i32) -> (i32, i32) {
    %c0_i32 = arith.constant 0 : i32
    %c0_i32_0 = arith.constant 0 : i32
    %c0_i32_1 = arith.constant 0 : i32
    return %c0_i32, %c0_i32_0 : i32, i32
  }
  func.func @transform_13(%arg0: i32) -> (i32, i32, i32) {
    %c0_i32 = arith.constant 0 : i32
    %c0_i32_0 = arith.constant 0 : i32
    %c0_i32_1 = arith.constant 0 : i32
    return %arg0, %c0_i32, %c0_i32_0 : i32, i32, i32
  }
}

</mosaic_0001>

<bundles_post_ra>
// kernel: forward.1
= control target key start
LH: loop header
LB: loop body
LE: loop exit
PB: predicated region body
PF: predicated region fallthrough
CT: control target
= control target key end

     0   :  { %s2209_s16 = smov 127   ;;  %s2210_s17 = smov 126   ;;  %v2212_v9 = vmov 0   ;;  %vm251_vm0 = vcmask 392192   ;;  %vm902_vm1 = vcmask 523264   ;;  %vm801_vm3 = vcmask 130048   ;;  %s2800_s0 = inlined_call_operand.vmem [shape: f32[1,32,128], index: 0, kind: input, shape index: {}]   ;;  %s2801_s1 = inlined_call_operand.vmem [shape: f32[32,128], index: 1, kind: input, shape index: {}]   ;;  %s2802_s2 = inlined_call_operand.vmem [shape: f32[32,1], index: 2, kind: input, shape index: {}]   ;;  %s2803_s3 = inlined_call_operand.vmem [shape: f32[16,48], index: 3, kind: input, shape index: {}]   ;;  %s2804_s4 = inlined_call_operand.vmem [shape: f32[16,1], index: 4, kind: input, shape index: {}]   ;;  %s2805_s5 = inlined_call_operand.vmem [shape: f32[16,48], index: 5, kind: input, shape index: {}]   ;;  %s2806_s8 = inlined_call_operand.vmem [shape: f32[16,1], index: 8, kind: input, shape index: {}]   ;;  %s2807_s7 = inlined_call_operand.vmem [shape: f32[16,64], index: 7, kind: input, shape index: {}]   ;;  %s2808_s6 = inlined_call_operand.vmem [shape: f32[16,1], index: 6, kind: input, shape index: {}]   ;;  %s2809_s9 = inlined_call_operand.vmem [shape: f32[16,64], index: 9, kind: input, shape index: {}]   ;;  %s2810_s10 = inlined_call_operand.vmem [shape: f32[16,1], index: 10, kind: input, shape index: {}]   ;;  %s2811_s12 = inlined_call_operand.vmem [shape: f32[2,1], index: 12, kind: input, shape index: {}]   ;;  %s2812_s11 = inlined_call_operand.vmem [shape: f32[2,32], index: 11, kind: input, shape index: {}]   ;;  %s2813_s13 = inlined_call_operand.vmem [shape: f32[1,2,8], index: 13, kind: output, shape index: {}]  }
   0x1   :  { %v44_v0 = vld [vmem:[%s2800_s0] sm:$0xff]  ;;  %v45_v1 = vld [vmem:[%s2800_s0 + $0x8] sm:$0xff]  ;;  %v46_v2 = vld [vmem:[%s2800_s0 + $0x10] sm:$0xff]  ;;  %s2211_s18 = smov 125   ;;  %2118 = vset.pattern.permute.xlu1 %v2212_v9  ;;  %2117 = vset.pattern.permute.xlu0 %v2212_v9  ;;  %s2216_s24 = smov 64   ;;  %vm2223_vm5 = vmmov 0  }
   0x2   :  { %v2087_v3 = vpack.i.bf16 %v45_v1, %v44_v0  ;;  %v47_v4 = vld [vmem:[%s2800_s0 + $0x18] sm:$0xff]  ;;  %v1977_v5 = vpack.c.bf16 %v45_v1, %v44_v0  ;;  %v88_v8 = vld [vmem:[%s2801_s1] sm:$0xff]  ;;  %v93_v10 = vld [vmem:[%s2802_s2 + $0x8] sm:$0xff]  ;;  %s2219_s25 = smov 16   ;;  %vm1584_vm6 = vcmask 1041409   ;;  %vm1586_vm7 = vcmask 1042434  }
   0x3   :  { %v1981_v6 = vpack.c.bf16 %v47_v4, %v46_v2  ;;  %v2092_v7 = vpack.i.bf16 %v47_v4, %v46_v2  ;;  %1892 = vmatprep.mubr.f32.mxu0 %v88_v8  ;;  %v92_v11 = vld [vmem:[%s2802_s2] sm:$0xff]  ;;  %v89_v36 = vld [vmem:[%s2801_s1 + $0x8] sm:$0xff]  ;;  %v90_v37 = vld [vmem:[%s2801_s1 + $0x10] sm:$0xff]  ;;  %vm1588_vm8 = vcmask 1043459   ;;  %vm1590_vm9 = vcmask 1044484  }
   0x4   :  { %2088 = vrot.lane.b32.xlu0 %v2087_v3, %s2209_s16  ;;  %2098 = vrot.lane.b32.xlu1 %v2087_v3, %s2210_s17  ;;  %v91_v38 = vld [vmem:[%s2801_s1 + $0x18] sm:$0xff]  ;;  %v237_v58 = vld [vmem:[%s2803_s3] sm:$0xff]  ;;  %vm1592_vm10 = vcmask 1045509   ;;  %vm1594_vm11 = vcmask 1046534   ;;  %vm1596_vm12 = vcmask 1047559   ;;  %vm1710_vm13 = vcmask 261120  }
   0x5   :  { %1978 = vmatprep.subr.bf16.mxu0 %v1977_v5  ;;  %1910 = vmatprep.mubr.msk.f32.mxu1 %vm251_vm0, %v237_v58  ;;  %v240_v61 = vld [vmem:[%s2804_s4 + $0x8] sm:$0xff]  ;;  %v239_v62 = vld [vmem:[%s2804_s4] sm:$0xff]  ;;  %v95_v1 = vld [vmem:[%s2802_s2 + $0x18] sm:$0xff]  ;;  %s2214_s4 = smov 96   ;;  %vm1784_vm14 = vcmask 58368  }
   0x6   :  { %1980 = vmatpush3.bf16.msra.mxu0 %v1977_v5  ;;  %v94_v2 = vld [vmem:[%s2802_s2 + $0x10] sm:$0xff]  ;;  %s2217_s2 = smov 48  }
   0x7   :  { %1982 = vmatprep.subr.bf16.mxu0 %v1981_v6 }
   0x8   :  { %2093 = vrot.lane.b32.xlu0 %v2092_v7, %s2209_s16  ;;  %2103 = vrot.lane.b32.xlu1 %v2092_v7, %s2210_s17 }
   0xa   :  { %1984 = vmatpush3.bf16.msra.mxu0 %v1981_v6 }
   0xc   :  { %2108 = vrot.lane.b32.xlu0 %v2087_v3, %s2211_s18  ;;  %2113 = vrot.lane.b32.xlu1 %v2092_v7, %s2211_s18 }
  0x10   :  { %103 = vperm.xlu1 %2118, %v93_v10   ;;  %98 = vperm.xlu0 %2117, %v92_v11   ;;  %v238_v11 = vld [vmem:[%s2803_s3 + $0x8] sm:$0xff]  ;;  %s2218_s3 = smov 32  }
  0x76   :  { %v2089_v12 = vpop.permute.xlu0 %2088  ;;  %v2099_v13 = vpop.permute.xlu1 %2098 }
  0x77   :  { %v2091_v14 = vunpack.i.h.bf16 %v2089_v12  ;;  %v2090_v15 = vunpack.i.l.bf16 %v2089_v12  ;;  %v2101_v17 = vunpack.i.h.bf16 %v2099_v13  ;;  %v2100_v18 = vunpack.i.l.bf16 %v2099_v13 }
  0x79   :  { %v1985_v16 = vpack.c.bf16 %v2091_v14, %v2090_v15  ;;  %v1993_v24 = vpack.c.bf16 %v2101_v17, %v2100_v18 }
  0x7a   :  { %v2094_v19 = vpop.permute.xlu0 %2093  ;;  %v2104_v20 = vpop.permute.xlu1 %2103 }
  0x7b   :  { %v2096_v21 = vunpack.i.h.bf16 %v2094_v19  ;;  %v2095_v22 = vunpack.i.l.bf16 %v2094_v19  ;;  %1986 = vmatprep.subr.bf16.mxu0 %v1985_v16  ;;  %v2106_v25 = vunpack.i.h.bf16 %v2104_v20  ;;  %v2105_v26 = vunpack.i.l.bf16 %v2104_v20 }
  0x7c   :  { %1988 = vmatpush3.bf16.msra.mxu0 %v1985_v16 }
  0x7d   :  { %v1989_v23 = vpack.c.bf16 %v2096_v21, %v2095_v22  ;;  %v1997_v28 = vpack.c.bf16 %v2106_v25, %v2105_v26 }
  0x7e   :  { %v2109_v27 = vpop.permute.xlu0 %2108  ;;  %v2114_v31 = vpop.permute.xlu1 %2113 }
  0x7f   :  { %1990 = vmatprep.subr.bf16.mxu0 %v1989_v23  ;;  %v2111_v29 = vunpack.i.h.bf16 %v2109_v27  ;;  %v2110_v30 = vunpack.i.l.bf16 %v2109_v27  ;;  %v2116_v33 = vunpack.i.h.bf16 %v2114_v31  ;;  %v2115_v34 = vunpack.i.l.bf16 %v2114_v31 }
  0x80   :  { %1992 = vmatpush3.bf16.msra.mxu0 %v1989_v23 }
  0x81   :  { %1994 = vmatprep.subr.bf16.mxu0 %v1993_v24  ;;  %v2001_v32 = vpack.c.bf16 %v2111_v29, %v2110_v30  ;;  %v2005_v35 = vpack.c.bf16 %v2116_v33, %v2115_v34 }
  0x84   :  { %1996 = vmatpush3.bf16.msra.mxu0 %v1993_v24 }
  0x85   :  { %1998 = vmatprep.subr.bf16.mxu0 %v1997_v28 }
  0x88   :  { %2000 = vmatpush3.bf16.msra.mxu0 %v1997_v28 }
  0x89   :  { %2002 = vmatprep.subr.bf16.mxu0 %v2001_v32 }
  0x8c   :  { %2004 = vmatpush3.bf16.msra.mxu0 %v2001_v32 }
  0x8d   :  { %2006 = vmatprep.subr.bf16.mxu0 %v2005_v35 }
  0x8f   :  { %v104_v39 = vpop.permute.xlu1 %103  ;;  %v99_v40 = vpop.permute.xlu0 %98 }
  0x90   :  { %2008 = vmatpush3.bf16.msra.mxu0 %v2005_v35 }
  0x93   :  { %1893 = vmatmul.mubr.f32.vlgmr.msra.gmra.mrb[0].mxu0 %v89_v36 }
  0x94   :  { %1895 = vmatprep.mubr.f32.mxu0 %v90_v37 }
  0x97   :  { %1896 = vmatmul.mubr.f32.gmra.mrb[2].mxu0 %v91_v38 }
 0x166   :  { %v1894_v41 = vpop.f32.mrb[0].mxu0 }
 0x167   :  { %v188_v42 = vadd.f32 %v1894_v41, %v104_v39  ;;  %v182_v43 = vpop.f32.mrb[1].mxu0 }
 0x168   :  { %v183_v44 = vadd.f32 %v182_v43, %v99_v40 }
 0x169   :  { %v202_v45 = vmax.f32 %v188_v42, 0.0 }
 0x16a   :  { %v201_v46 = vmax.f32 %v183_v44, 0.0  ;;  %v1897_v63 = vpop.f32.mrb[2].mxu0  ;;  %v367_v44 = vld [vmem:[%s2805_s5] sm:$0xff] }
 0x16b   :  { %v192_v0 = vpop.f32.mrb[3].mxu0 }
 0x16c   :  { %v2124_v47 = vpack.i.bf16 %v202_v45, %v201_v46 }
 0x16e   :  { %2125 = vrot.lane.b32.xlu0 %v2124_v47, %s2210_s17  ;;  %2120 = vrot.lane.b32.xlu1 %v2124_v47, %s2209_s16 }
 0x1e0   :  { %v2126_v48 = vpop.permute.xlu0 %2125  ;;  %v2121_v49 = vpop.permute.xlu1 %2120 }
 0x1e1   :  { %v2123_v50 = vunpack.i.h.bf16 %v2121_v49  ;;  %v2122_v51 = vunpack.i.l.bf16 %v2121_v49  ;;  %v2128_v52 = vunpack.i.h.bf16 %v2126_v48  ;;  %v2127_v53 = vunpack.i.l.bf16 %v2126_v48 }
 0x1e3   :  { %v214_v54 = vmax.f32 %v202_v45, %v2123_v50  ;;  %v213_v55 = vmax.f32 %v201_v46, %v2122_v51 }
 0x1e5   :  { %v222_v56 = vmax.f32 %v214_v54, %v2128_v52  ;;  %v221_v57 = vmax.f32 %v213_v55, %v2127_v53  ;;  %v890_v53 = vld [vmem:[%s2806_s8] sm:$0xff]  ;;  %v891_v54 = vld [vmem:[%s2806_s8 + $0x8] sm:$0xff] }
 0x1e7   :  { %v2134_v59 = vpack.i.bf16 %v222_v56, %v221_v57  ;;  %v2009_v60 = vpack.c.bf16 %v222_v56, %v221_v57 }
 0x1e9   :  { %2135 = vrot.lane.b32.xlu0 %v2134_v59, %s2210_s17  ;;  %2130 = vrot.lane.b32.xlu1 %v2134_v59, %s2209_s16 }
 0x1ea   :  { %2010 = vmatprep.subr.bf16.mxu1 %v2009_v60 }
 0x1eb   :  { %2012 = vmatpush3.bf16.msra.mxu1 %v2009_v60 }
 0x1ed   :  { %248 = vperm.xlu0 %2117, %v240_v61   ;;  %243 = vperm.xlu1 %2118, %v239_v62  }
 0x1f1   :  { %113 = vperm.xlu0 %2117, %v95_v1   ;;  %108 = vperm.xlu1 %2118, %v94_v2  }
 0x25b   :  { %v2136_v3 = vpop.permute.xlu0 %2135  ;;  %v2131_v4 = vpop.permute.xlu1 %2130 }
 0x25c   :  { %v2138_v5 = vunpack.i.h.bf16 %v2136_v3  ;;  %v2137_v6 = vunpack.i.l.bf16 %v2136_v3  ;;  %v2133_v7 = vunpack.i.h.bf16 %v2131_v4  ;;  %v2132_v8 = vunpack.i.l.bf16 %v2131_v4  ;;  %v368_v3 = vld [vmem:[%s2805_s5 + $0x8] sm:$0xff]  ;;  %v888_v4 = vld [vmem:[%s2807_s7] sm:$0xff] }
 0x25e   :  { %v2013_v9 = vpack.c.bf16 %v2133_v7, %v2132_v8  ;;  %v2017_v10 = vpack.c.bf16 %v2138_v5, %v2137_v6 }
 0x260   :  { %2014 = vmatprep.subr.bf16.mxu1 %v2013_v9 }
 0x261   :  { %2016 = vmatpush3.bf16.msra.mxu1 %v2013_v9 }
 0x262   :  { %2018 = vmatprep.subr.bf16.mxu1 %v2017_v10 }
 0x265   :  { %2020 = vmatpush3.bf16.msra.mxu1 %v2017_v10 }
 0x268   :  { %1911 = vmatmul.mubr.msk.f32.vlgmr.msra.gmra.mrb[0].mxu1 %vm251_vm0, %v238_v11 }
 0x269   :  { %1925 = vmatprep.mubr.msk.f32.mxu1 %vm251_vm0, %v367_v44 }
 0x26c   :  { %v249_v12 = vpop.permute.xlu0 %248  ;;  %v244_v13 = vpop.permute.xlu1 %243 }
 0x270   :  { %v114_v14 = vpop.permute.xlu0 %113  ;;  %v109_v15 = vpop.permute.xlu1 %108 }
 0x271   :  { %v198_v19 = vadd.f32 %v1897_v63, %v114_v14  ;;  %v193_v20 = vadd.f32 %v192_v0, %v109_v15 }
 0x273   :  { %v204_v24 = vmax.f32 %v198_v19, 0.0  ;;  %v203_v25 = vmax.f32 %v193_v20, 0.0 }
 0x275   :  { %v2154_v27 = vpack.i.bf16 %v204_v24, %v203_v25 }
 0x33b   :  { %v1912_v16 = vpop.f32.mrb[0].mxu1 }
 0x33c   :  { %v330_v17 = vadd.f32 %v1912_v16, %v249_v12  ;;  %v324_v18 = vpop.f32.mrb[1].mxu1 }
 0x33d   :  { %v325_v21 = vadd.f32 %v324_v18, %v244_v13  ;;  %v889_v13 = vld [vmem:[%s2807_s7 + $0x8] sm:$0xff] }
 0x33e   :  { %v334_v22 = vmax.f32 %v330_v17, 0.0 }
 0x33f   :  { %v333_v23 = vmax.f32 %v325_v21, 0.0 }
 0x341   :  { %v2144_v26 = vpack.i.bf16 %v334_v22, %v333_v23 }
 0x343   :  { %2145 = vrot.lane.b32.xlu0 %v2144_v26, %s2210_s17  ;;  %2140 = vrot.lane.b32.xlu1 %v2144_v26, %s2209_s16 }
 0x347   :  { %2155 = vrot.lane.b32.xlu0 %v2154_v27, %s2210_s17  ;;  %2150 = vrot.lane.b32.xlu1 %v2154_v27, %s2209_s16 }
 0x3b5   :  { %v2146_v28 = vpop.permute.xlu0 %2145  ;;  %v2141_v29 = vpop.permute.xlu1 %2140 }
 0x3b6   :  { %v2143_v30 = vunpack.i.h.bf16 %v2141_v29  ;;  %v2142_v31 = vunpack.i.l.bf16 %v2141_v29  ;;  %v2148_v32 = vunpack.i.h.bf16 %v2146_v28  ;;  %v2147_v33 = vunpack.i.l.bf16 %v2146_v28 }
 0x3b8   :  { %v344_v34 = vmax.f32 %v334_v22, %v2143_v30  ;;  %v343_v35 = vmax.f32 %v333_v23, %v2142_v31 }
 0x3b9   :  { %v2151_v36 = vpop.permute.xlu1 %2150  ;;  %v2156_v39 = vpop.permute.xlu0 %2155 }
 0x3ba   :  { %v352_v37 = vmax.f32 %v344_v34, %v2148_v32  ;;  %v351_v38 = vmax.f32 %v343_v35, %v2147_v33  ;;  %v2153_v40 = vunpack.i.h.bf16 %v2151_v36  ;;  %v2152_v41 = vunpack.i.l.bf16 %v2151_v36 }
 0x3bb   :  { %v2158_v45 = vunpack.i.h.bf16 %v2156_v39  ;;  %v2157_v46 = vunpack.i.l.bf16 %v2156_v39  ;;  %v1026_v39 = vld [vmem:[%s2810_s10] sm:$0xff] }
 0x3bc   :  { %v2164_v42 = vpack.i.bf16 %v352_v37, %v351_v38  ;;  %v2021_v43 = vpack.c.bf16 %v352_v37, %v351_v38  ;;  %v859_v47 = vmax.f32 %v204_v24, %v2153_v40  ;;  %v858_v48 = vmax.f32 %v203_v25, %v2152_v41  ;;  %v369_v37 = vld [vmem:[%s2808_s6] sm:$0xff]  ;;  %v370_v40 = vld [vmem:[%s2808_s6 + $0x8] sm:$0xff] }
 0x3bd   :  { %v1024_v38 = vld [vmem:[%s2809_s9] sm:$0xff]  ;;  %v1027_v41 = vld [vmem:[%s2810_s10 + $0x8] sm:$0xff] }
 0x3be   :  { %2165 = vrot.lane.b32.xlu0 %v2164_v42, %s2210_s17  ;;  %2160 = vrot.lane.b32.xlu1 %v2164_v42, %s2209_s16  ;;  %v867_v49 = vmax.f32 %v859_v47, %v2158_v45  ;;  %v866_v50 = vmax.f32 %v858_v48, %v2157_v46 }
 0x3bf   :  { %2022 = vmatprep.subr.bf16.mxu1 %v2021_v43  ;;  %1963 = vmatprep.mubr.msk.f32.mxu0 %vm902_vm1, %v1024_v38 }
 0x3c0   :  { %2024 = vmatpush3.bf16.msra.mxu1 %v2021_v43  ;;  %v2174_v51 = vpack.i.bf16 %v867_v49, %v866_v50  ;;  %v2033_v52 = vpack.c.bf16 %v867_v49, %v866_v50 }
 0x3c2   :  { %2175 = vrot.lane.b32.xlu0 %v2174_v51, %s2210_s17  ;;  %2170 = vrot.lane.b32.xlu1 %v2174_v51, %s2209_s16 }
 0x3c6   :  { %894 = vperm.xlu0 %2117, %v890_v53   ;;  %2180 = vrot.lane.b32.xlu1 %v2174_v51, %s2211_s18 }
 0x3ca   :  { %899 = vperm.xlu1 %2118, %v891_v54   ;;  %v1025_v54 = vld [vmem:[%s2809_s9 + $0x8] sm:$0xff]  ;;  %s2215_s9 = smov 80  }
 0x430   :  { %v2166_v55 = vpop.permute.xlu0 %2165  ;;  %v2161_v56 = vpop.permute.xlu1 %2160 }
 0x431   :  { %v2168_v57 = vunpack.i.h.bf16 %v2166_v55  ;;  %v2167_v58 = vunpack.i.l.bf16 %v2166_v55  ;;  %v2163_v59 = vunpack.i.h.bf16 %v2161_v56  ;;  %v2162_v60 = vunpack.i.l.bf16 %v2161_v56 }
 0x433   :  { %v2025_v61 = vpack.c.bf16 %v2163_v59, %v2162_v60  ;;  %v2029_v62 = vpack.c.bf16 %v2168_v57, %v2167_v58 }
 0x434   :  { %v2171_v63 = vpop.permute.xlu1 %2170  ;;  %v2176_v2 = vpop.permute.xlu0 %2175 }
 0x435   :  { %2026 = vmatprep.subr.bf16.mxu1 %v2025_v61  ;;  %v2173_v0 = vunpack.i.h.bf16 %v2171_v63  ;;  %v2172_v1 = vunpack.i.l.bf16 %v2171_v63  ;;  %v2178_v5 = vunpack.i.h.bf16 %v2176_v2  ;;  %v2177_v6 = vunpack.i.l.bf16 %v2176_v2 }
 0x436   :  { %2028 = vmatpush3.bf16.msra.mxu1 %v2025_v61 }
 0x437   :  { %2030 = vmatprep.subr.bf16.mxu1 %v2029_v62  ;;  %v2037_v7 = vpack.c.bf16 %v2173_v0, %v2172_v1  ;;  %v2041_v9 = vpack.c.bf16 %v2178_v5, %v2177_v6 }
 0x438   :  { %v2181_v8 = vpop.permute.xlu1 %2180 }
 0x439   :  { %v2183_v10 = vunpack.i.h.bf16 %v2181_v8  ;;  %v2182_v11 = vunpack.i.l.bf16 %v2181_v8 }
 0x43a   :  { %2032 = vmatpush3.bf16.msra.mxu1 %v2029_v62 }
 0x43b   :  { %2034 = vmatprep.subr.bf16.mxu1 %v2033_v52  ;;  %v2045_v12 = vpack.c.bf16 %v2183_v10, %v2182_v11 }
 0x43d   :  { %1926 = vmatmul.mubr.msk.f32.vlgmr.msra.gmra.mrb[2].mxu1 %vm251_vm0, %v368_v3 }
 0x43e   :  { %2036 = vmatpush3.bf16.msra.mxu1 %v2033_v52  ;;  %1944 = vmatprep.mubr.msk.f32.mxu1 %vm902_vm1, %v888_v4 }
 0x43f   :  { %2038 = vmatprep.subr.bf16.mxu1 %v2037_v7 }
 0x442   :  { %2040 = vmatpush3.bf16.msra.mxu1 %v2037_v7 }
 0x443   :  { %2042 = vmatprep.subr.bf16.mxu1 %v2041_v9 }
 0x445   :  { %v895_v18 = vpop.permute.xlu0 %894 }
 0x446   :  { %2044 = vmatpush3.bf16.msra.mxu1 %v2041_v9 }
 0x447   :  { %2046 = vmatprep.subr.bf16.mxu1 %v2045_v12 }
 0x449   :  { %v900_v16 = vpop.permute.xlu1 %899 }
 0x44a   :  { %2048 = vmatpush3.bf16.msra.mxu1 %v2045_v12 }
 0x44d   :  { %1945 = vmatmul.mubr.msk.f32.vlgmr.msra.gmra.mrb[4].mxu1 %vm902_vm1, %v889_v13 }
 0x510   :  { %v2386_v14 = vpop.f32.mrb[2].mxu1 }
 0x511   :  { %v2388_v15 = vpop.f32.mrb[3].mxu1 }
 0x520   :  { %v1946_v17 = vpop.f32.mrb[4].mxu1 }
 0x521   :  { %v981_v19 = vadd.f32 %v1946_v17, %v900_v16  ;;  %v975_v20 = vpop.f32.mrb[5].mxu1  ;;  %v2220_v16 = vmov 1983009808  }
 0x522   :  { %v976_v21 = vadd.f32 %v975_v20, %v895_v18  ;;  %v511_v17 = vunpack.c.l.s4 %v2220_v16  ;;  %v513_v18 = vlaneseq }
 0x523   :  { %v985_v22 = vmax.f32 %v981_v19, 0.0 }
 0x524   :  { %v984_v23 = vmax.f32 %v976_v21, 0.0  ;;  %v512_v21 = vunpack.c.0.s8 %v511_v17 }
 0x526   :  { %v2189_v24 = vpack.i.bf16 %v985_v22, %v984_v23 }
 0x528   :  { %2190 = vrot.lane.b32.xlu1 %v2189_v24, %s2210_s17  ;;  %2185 = vrot.lane.b32.xlu0 %v2189_v24, %s2209_s16 }
 0x59a   :  { %v2191_v25 = vpop.permute.xlu1 %2190  ;;  %v2186_v26 = vpop.permute.xlu0 %2185 }
 0x59b   :  { %v2188_v27 = vunpack.i.h.bf16 %v2186_v26  ;;  %v2187_v28 = vunpack.i.l.bf16 %v2186_v26  ;;  %v2193_v29 = vunpack.i.h.bf16 %v2191_v25  ;;  %v2192_v30 = vunpack.i.l.bf16 %v2191_v25 }
 0x59c   :  { %v2221_v25 = vmov 1934713408  }
 0x59d   :  { %v995_v31 = vmax.f32 %v985_v22, %v2188_v27  ;;  %v994_v32 = vmax.f32 %v984_v23, %v2187_v28  ;;  %v2501_v22 = vshrl.u32 %v513_v18, 7  ;;  %v575_v26 = vunpack.c.l.s4 %v2221_v25 }
 0x59f   :  { %v1003_v33 = vmax.f32 %v995_v31, %v2193_v29  ;;  %v1002_v34 = vmax.f32 %v994_v32, %v2192_v30  ;;  %v2504_v27 = vsub.s32 %v512_v21, %v2501_v22 }
 0x5a1   :  { %v2199_v35 = vpack.i.bf16 %v1003_v33, %v1002_v34  ;;  %v2049_v36 = vpack.c.bf16 %v1003_v33, %v1002_v34  ;;  %v576_v33 = vunpack.c.0.s8 %v575_v26 }
 0x5a3   :  { %2200 = vrot.lane.b32.xlu1 %v2199_v35, %s2210_s17  ;;  %2195 = vrot.lane.b32.xlu0 %v2199_v35, %s2209_s16 }
 0x5a4   :  { %2050 = vmatprep.subr.bf16.mxu0 %v2049_v36 }
 0x5a5   :  { %2052 = vmatpush3.bf16.msra.mxu0 %v2049_v36 }
 0x5a7   :  { %373 = vperm.xlu1 %2118, %v369_v37   ;;  %2205 = vrot.lane.b32.xlu0 %v2199_v35, %s2211_s18  ;;  %s2213_s18 = smov 112  }
 0x5ab   :  { %1030 = vperm.xlu1 %2118, %v1026_v39   ;;  %378 = vperm.xlu0 %2117, %v370_v40  }
 0x5af   :  { %1035 = vperm.xlu0 %2117, %v1027_v41  }
 0x615   :  { %v2201_v42 = vpop.permute.xlu1 %2200  ;;  %v2196_v43 = vpop.permute.xlu0 %2195 }
 0x616   :  { %v2203_v44 = vunpack.i.h.bf16 %v2201_v42  ;;  %v2202_v45 = vunpack.i.l.bf16 %v2201_v42  ;;  %v2198_v46 = vunpack.i.h.bf16 %v2196_v43  ;;  %v2197_v47 = vunpack.i.l.bf16 %v2196_v43 }
 0x618   :  { %v2053_v48 = vpack.c.bf16 %v2198_v46, %v2197_v47  ;;  %v2057_v50 = vpack.c.bf16 %v2203_v44, %v2202_v45  ;;  %v2526_v45 = vsub.s32 %v576_v33, %v2501_v22 }
 0x619   :  { %v2206_v49 = vpop.permute.xlu0 %2205 }
 0x61a   :  { %v2208_v51 = vunpack.i.h.bf16 %v2206_v49  ;;  %v2207_v52 = vunpack.i.l.bf16 %v2206_v49  ;;  %2054 = vmatprep.subr.bf16.mxu0 %v2053_v48  ;;  %v2530_v49 = vand.u32 127, %v513_v18 }
 0x61b   :  { %2056 = vmatpush3.bf16.msra.mxu0 %v2053_v48 }
 0x61c   :  { %2058 = vmatprep.subr.bf16.mxu0 %v2057_v50  ;;  %v2061_v53 = vpack.c.bf16 %v2208_v51, %v2207_v52  ;;  %vm782_vm2 = vcmp.lt.s32.totalorder %v2530_v49, 6  ;;  %vm1437_vm4 = vcmp.lt.s32.totalorder %v2530_v49, 3 }
 0x61f   :  { %2060 = vmatpush3.bf16.msra.mxu0 %v2057_v50 }
 0x620   :  { %2062 = vmatprep.subr.bf16.mxu0 %v2061_v53 }
 0x623   :  { %2064 = vmatpush3.bf16.msra.mxu0 %v2061_v53 }
 0x626   :  { %v374_v55 = vpop.permute.xlu1 %373  ;;  %1964 = vmatmul.mubr.msk.f32.vlgmr.msra.gmra.mrb[4].mxu0 %vm902_vm1, %v1025_v54 }
 0x627   :  { %v454_v56 = vadd.f32 %v2388_v15, %v374_v55 }
 0x629   :  { %v2416_v57 = vmax.f32 %v454_v56, 0.0 }
 0x62a   :  { %v379_v58 = vpop.permute.xlu0 %378  ;;  %v1031_v61 = vpop.permute.xlu1 %1030 }
 0x62b   :  { %v459_v59 = vadd.f32 %v2386_v14, %v379_v58  ;;  %466 = vrot.lane.b32.xlu1 %v2416_v57, %s2213_s18 }
 0x62d   :  { %v2421_v60 = vmax.f32 %v459_v59, 0.0 }
 0x62e   :  { %v1036_v62 = vpop.permute.xlu0 %1035 }
 0x62f   :  { %472 = vrot.lane.b32.xlu1 %v2416_v57, %s2214_s4  ;;  %468 = vrot.lane.b32.xlu0 %v2421_v60, %s2213_s18 }
 0x633   :  { %478 = vrot.lane.b32.xlu1 %v2416_v57, %s2215_s9  ;;  %474 = vrot.lane.b32.xlu0 %v2421_v60, %s2214_s4 }
 0x637   :  { %484 = vrot.lane.b32.xlu1 %v2416_v57, %s2216_s24  ;;  %480 = vrot.lane.b32.xlu0 %v2421_v60, %s2215_s9 }
 0x63b   :  { %490 = vrot.lane.b32.xlu1 %v2416_v57, %s2217_s2  ;;  %486 = vrot.lane.b32.xlu0 %v2421_v60, %s2216_s24 }
 0x63f   :  { %496 = vrot.lane.b32.xlu1 %v2416_v57, %s2218_s3  ;;  %492 = vrot.lane.b32.xlu0 %v2421_v60, %s2217_s2 }
 0x643   :  { %502 = vrot.lane.b32.xlu1 %v2416_v57, %s2219_s25  ;;  %498 = vrot.lane.b32.xlu0 %v2421_v60, %s2218_s3 }
 0x647   :  { %504 = vrot.lane.b32.xlu0 %v2421_v60, %s2219_s25 }
 0x69d   :  { %v2449_v63 = vpop.permute.xlu1 %466 }
 0x6a1   :  { %v2451_v1 = vpop.permute.xlu0 %468  ;;  %v2453_v5 = vpop.permute.xlu1 %472 }
 0x6a2   :  { %v508_v30 = vcombine.low %v2416_v57, %v2453_v5 }
 0x6a4   :  { %v516_v38 = vrot.slane %v508_v30, %v2504_v27 }
 0x6a5   :  { %v2463_v8 = vpop.permute.xlu0 %474  ;;  %v2465_v9 = vpop.permute.xlu1 %478 }
 0x6a6   :  { %v524_v28 = vcombine.low %v2449_v63, %v2465_v9  ;;  %v644_v39 = vcombine.low %v2421_v60, %v2463_v8  ;;  %v525_v56 = vcombine.high %v2449_v63, %v2465_v9 }
 0x6a8   :  { %v532_v34 = vrot.slane %v524_v28, %v2504_v27  ;;  %v652_v46 = vrot.slane %v644_v39, %v2504_v27  ;;  %v539_v63 = vrot.slane %v525_v56, %v2504_v27 }
 0x6a9   :  { %v2471_v10 = vpop.permute.xlu0 %480  ;;  %v2477_v11 = vpop.permute.xlu1 %484 }
 0x6aa   :  { %v660_v35 = vcombine.low %v2451_v1, %v2471_v10  ;;  %v572_v42 = vcombine.low %v516_v38, %v532_v34  ;;  %v573_v58 = vcombine.high %v516_v38, %v532_v34 }
 0x6ac   :  { %v668_v43 = vrot.slane %v660_v35, %v2504_v27  ;;  %v580_v51 = vrot.slane %v572_v42, %v2526_v45  ;;  %v587_v9 = vrot.slane %v573_v58, %v2526_v45 }
 0x6ad   :  { %v2483_v12 = vpop.permute.xlu0 %486  ;;  %v491_v13 = vpop.permute.xlu1 %490 }
 0x6ae   :  { %v708_v50 = vcombine.low %v652_v46, %v668_v43  ;;  %v709_v17 = vcombine.high %v652_v46, %v668_v43 }
 0x6b1   :  { %v2489_v14 = vpop.permute.xlu0 %492  ;;  %v497_v15 = vpop.permute.xlu1 %496 }
 0x6b2   :  { %v540_v29 = vcombine.low %v2477_v11, %v497_v15  ;;  %v541_v59 = vcombine.high %v2477_v11, %v497_v15 }
 0x6b4   :  { %v548_v36 = vrot.slane %v540_v29, %v2504_v27  ;;  %v555_v11 = vrot.slane %v541_v59, %v2504_v27 }
 0x6b5   :  { %v2499_v19 = vpop.permute.xlu0 %498  ;;  %v503_v20 = vpop.permute.xlu1 %502 }
 0x6b6   :  { %v556_v23 = vcombine.low %v491_v13, %v503_v20  ;;  %v676_v37 = vcombine.low %v2483_v12, %v2499_v19  ;;  %v557_v52 = vcombine.high %v491_v13, %v503_v20  ;;  %v677_v21 = vcombine.high %v2483_v12, %v2499_v19 }
 0x6b7   :  { %v723_v19 = vrot.slane %v709_v17, %v2526_v45 }
 0x6b8   :  { %v564_v31 = vrot.slane %v556_v23, %v2504_v27  ;;  %v684_v44 = vrot.slane %v676_v37, %v2504_v27  ;;  %v691_v30 = vrot.slane %v677_v21, %v2504_v27 }
 0x6b9   :  { %v505_v24 = vpop.permute.xlu0 %504 }
 0x6ba   :  { %v692_v32 = vcombine.low %v2489_v14, %v505_v24  ;;  %v604_v40 = vcombine.low %v548_v36, %v564_v31  ;;  %v605_v53 = vcombine.high %v548_v36, %v564_v31  ;;  %v693_v13 = vcombine.high %v2489_v14, %v505_v24 }
 0x6bb   :  { %v645_v24 = vcombine.high %v2421_v60, %v2463_v8 }
 0x6bc   :  { %v700_v41 = vrot.slane %v692_v32, %v2504_v27  ;;  %v612_v48 = vrot.slane %v604_v40, %v2526_v45  ;;  %v707_v26 = vrot.slane %v693_v13, %v2504_v27 }
 0x6bd   :  { %v659_v32 = vrot.slane %v645_v24, %v2504_v27 }
 0x6be   :  { %v740_v47 = vcombine.low %v684_v44, %v700_v41  ;;  %v637_v54 = vcombine.high %v580_v51, %v612_v48  ;;  %v741_v15 = vcombine.high %v684_v44, %v700_v41  ;;  %v636_v16 = vcombine.low %v580_v51, %v612_v48 }
 0x6bf   :  { %v756_v34 = vcombine.low %v691_v30, %v707_v26  ;;  %v757_v56 = vcombine.high %v691_v30, %v707_v26 }
 0x6c0   :  { %v748_v55 = vrot.slane %v740_v47, %v2526_v45  ;;  %v755_v28 = vrot.slane %v741_v15, %v2526_v45 }
 0x6c1   :  { %v764_v48 = vrot.slane %v756_v34, %v2526_v45 }
 0x6c2   :  { %v774_v36 = vcombine.low %v723_v19, %v755_v28  ;;  %v775_v47 = vcombine.high %v723_v19, %v755_v28  ;;  %v2222_v28 = vmov 0.0|0.0  }
 0x6c3   :  { %2065 = vmatprep.subr.bf16.mxu1 %v2222_v28 }
 0x6c4   :  { %v795_v46 = vsel %vm782_vm2, %v774_v36, 0.0  ;;  %v796_v58 = vsel %vm782_vm2, %v775_v47, 0.0 }
 0x6f9   :  { %v1965_v0 = vpop.f32.mrb[4].mxu0 }
 0x6fa   :  { %v1116_v2 = vadd.f32 %v1965_v0, %v1036_v62  ;;  %v1110_v3 = vpop.f32.mrb[5].mxu0  ;;  %v509_v62 = vcombine.high %v2416_v57, %v2453_v5  ;;  %v571_v0 = vrot.slane %v557_v52, %v2504_v27  ;;  %v661_v5 = vcombine.high %v2451_v1, %v2471_v10 }
 0x6fb   :  { %v1111_v4 = vadd.f32 %v1110_v3, %v1031_v61  ;;  %v716_v61 = vrot.slane %v708_v50, %v2526_v45  ;;  %v785_v1 = vsel %vm782_vm2, %v636_v16, 0.0 }
 0x6fc   :  { %v2455_v6 = vmax.f32 %v1116_v2, 0.0  ;;  %v786_v2 = vsel %vm782_vm2, %v637_v54, 0.0  ;;  %v523_v57 = vrot.slane %v509_v62, %v2504_v27  ;;  %v620_v20 = vcombine.low %v555_v11, %v571_v0 }
 0x6fd   :  { %v2457_v7 = vmax.f32 %v1111_v4, 0.0  ;;  %v772_v3 = vcombine.low %v716_v61, %v748_v55  ;;  %v619_v4 = vrot.slane %v605_v53, %v2526_v45  ;;  %v805_v18 = vsel %vm801_vm3, %v786_v2, -inf }
 0x6fe   :  { %1125 = vrot.lane.b32.xlu0 %v2455_v6, %s2213_s18  ;;  %v588_v14 = vcombine.low %v523_v57, %v539_v63  ;;  %v773_v10 = vcombine.high %v716_v61, %v748_v55  ;;  %v675_v29 = vrot.slane %v661_v5, %v2504_v27  ;;  %v628_v31 = vrot.slane %v620_v20, %v2526_v45 }
 0x6ff   :  { %1123 = vrot.lane.b32.xlu1 %v2457_v7, %s2213_s18  ;;  %v793_v23 = vsel %vm782_vm2, %v772_v3, 0.0  ;;  %v638_v25 = vcombine.low %v587_v9, %v619_v4  ;;  %v639_v8 = vcombine.high %v587_v9, %v619_v4  ;;  %v802_v33 = vsel %vm801_vm3, %v785_v1, -inf }
 0x700   :  { %v826_v12 = vsel %vm801_vm3, %v793_v23, -inf  ;;  %v794_v35 = vsel %vm782_vm2, %v773_v10, 0.0  ;;  %v596_v37 = vrot.slane %v588_v14, %v2526_v45  ;;  %v724_v39 = vcombine.low %v659_v32, %v675_v29 }
 0x701   :  { %v787_v60 = vsel %vm782_vm2, %v638_v25, 0.0  ;;  %v621_v40 = vcombine.high %v555_v11, %v571_v0  ;;  %v788_v41 = vsel %vm782_vm2, %v639_v8, 0.0  ;;  %v829_v43 = vsel %vm801_vm3, %v794_v35, -inf }
 0x702   :  { %1131 = vrot.lane.b32.xlu0 %v2455_v6, %s2214_s4  ;;  %v808_v38 = vsel %vm801_vm3, %v787_v60, -inf  ;;  %v640_v42 = vcombine.low %v596_v37, %v628_v31  ;;  %v589_v44 = vcombine.high %v523_v57, %v539_v63  ;;  %v811_v50 = vsel %vm801_vm3, %v788_v41, -inf }
 0x703   :  { %1129 = vrot.lane.b32.xlu1 %v2457_v7, %s2214_s4  ;;  %v641_v52 = vcombine.high %v596_v37, %v628_v31  ;;  %v732_v53 = vrot.slane %v724_v39, %v2526_v45  ;;  %v635_v54 = vrot.slane %v621_v40, %v2526_v45  ;;  %v832_v55 = vsel %vm801_vm3, %v795_v46, -inf }
 0x704   :  { %v789_v51 = vsel %vm782_vm2, %v640_v42, 0.0  ;;  %v603_v61 = vrot.slane %v589_v44, %v2526_v45  ;;  %v725_v0 = vcombine.high %v659_v32, %v675_v29  ;;  %v835_v4 = vsel %vm801_vm3, %v796_v58, -inf }
 0x705   :  { %v776_v59 = vcombine.low %v732_v53, %v764_v48  ;;  %v814_v62 = vsel %vm801_vm3, %v789_v51, -inf  ;;  %v790_v2 = vsel %vm782_vm2, %v641_v52, 0.0  ;;  %v777_v9 = vcombine.high %v732_v53, %v764_v48 }
 0x706   :  { %1137 = vrot.lane.b32.xlu0 %v2455_v6, %s2215_s9  ;;  %v642_v3 = vcombine.low %v603_v61, %v635_v54  ;;  %v771_v11 = vrot.slane %v757_v56, %v2526_v45  ;;  %v817_v13 = vsel %vm801_vm3, %v790_v2, -inf  ;;  %v643_v16 = vcombine.high %v603_v61, %v635_v54 }
 0x707   :  { %1135 = vrot.lane.b32.xlu1 %v2457_v7, %s2215_s9  ;;  %v797_v63 = vsel %vm782_vm2, %v776_v59, 0.0  ;;  %v739_v57 = vrot.slane %v725_v0, %v2526_v45  ;;  %v798_v17 = vsel %vm782_vm2, %v777_v9, 0.0 }
 0x708   :  { %v791_v15 = vsel %vm782_vm2, %v642_v3, 0.0  ;;  %v838_v5 = vsel %vm801_vm3, %v797_v63, -inf  ;;  %v792_v21 = vsel %vm782_vm2, %v643_v16, 0.0  ;;  %v841_v23 = vsel %vm801_vm3, %v798_v17, -inf }
 0x709   :  { %v820_v20 = vsel %vm801_vm3, %v791_v15, -inf  ;;  %v779_v14 = vcombine.high %v739_v57, %v771_v11  ;;  %v823_v24 = vsel %vm801_vm3, %v792_v21, -inf }
 0x70a   :  { %1143 = vrot.lane.b32.xlu0 %v2455_v6, %s2216_s24 }
 0x70b   :  { %1141 = vrot.lane.b32.xlu1 %v2457_v7, %s2216_s24  ;;  %v800_v1 = vsel %vm782_vm2, %v779_v14, 0.0 }
 0x70c   :  { %v847_v10 = vsel %vm801_vm3, %v800_v1, -inf }
 0x70e   :  { %1149 = vrot.lane.b32.xlu0 %v2455_v6, %s2217_s2 }
 0x70f   :  { %1147 = vrot.lane.b32.xlu1 %v2457_v7, %s2217_s2 }
 0x712   :  { %1155 = vrot.lane.b32.xlu0 %v2455_v6, %s2218_s3 }
 0x713   :  { %1153 = vrot.lane.b32.xlu1 %v2457_v7, %s2218_s3 }
 0x716   :  { %1161 = vrot.lane.b32.xlu0 %v2455_v6, %s2219_s25 }
 0x717   :  { %1159 = vrot.lane.b32.xlu1 %v2457_v7, %s2219_s25 }
 0x735   :  { %806 = vmax.xlane.f32.xlu0 %v805_v18  ;;  %v778_v18 = vcombine.low %v739_v57, %v771_v11 }
 0x737   :  { %v799_v25 = vsel %vm782_vm2, %v778_v18, 0.0 }
 0x738   :  { %v844_v26 = vsel %vm801_vm3, %v799_v25, -inf }
 0x739   :  { %827 = vmax.xlane.f32.xlu0 %v826_v12 }
 0x73b   :  { %803 = vmax.xlane.f32.xlu1 %v802_v33 }
 0x73d   :  { %809 = vmax.xlane.f32.xlu0 %v808_v38 }
 0x73f   :  { %830 = vmax.xlane.f32.xlu1 %v829_v43 }
 0x741   :  { %812 = vmax.xlane.f32.xlu0 %v811_v50 }
 0x743   :  { %833 = vmax.xlane.f32.xlu1 %v832_v55 }
 0x745   :  { %815 = vmax.xlane.f32.xlu0 %v814_v62 }
 0x747   :  { %836 = vmax.xlane.f32.xlu1 %v835_v4 }
 0x749   :  { %818 = vmax.xlane.f32.xlu0 %v817_v13 }
 0x74b   :  { %839 = vmax.xlane.f32.xlu1 %v838_v5 }
 0x74d   :  { %821 = vmax.xlane.f32.xlu0 %v820_v20 }
 0x74f   :  { %842 = vmax.xlane.f32.xlu1 %v841_v23 }
 0x751   :  { %824 = vmax.xlane.f32.xlu0 %v823_v24 }
 0x753   :  { %845 = vmax.xlane.f32.xlu1 %v844_v26 }
 0x757   :  { %848 = vmax.xlane.f32.xlu1 %v847_v10 }
 0x770   :  { %v1126_v29 = vpop.permute.xlu0 %1125 }
 0x771   :  { %v2617_v12 = vpop.permute.xlu1 %1123 }
 0x774   :  { %v1132_v19 = vpop.permute.xlu0 %1131 }
 0x775   :  { %v1130_v30 = vpop.permute.xlu1 %1129  ;;  %v1301_v37 = vcombine.low %v2455_v6, %v1132_v19  ;;  %v1302_v38 = vcombine.high %v2455_v6, %v1132_v19 }
 0x776   :  { %v1165_v40 = vcombine.low %v2457_v7, %v1130_v30  ;;  %v1166_v48 = vcombine.high %v2457_v7, %v1130_v30 }
 0x777   :  { %v1309_v46 = vrot.slane %v1301_v37, %v2504_v27  ;;  %v2627_v47 = vrot.slane %v1302_v38, %v2504_v27 }
 0x778   :  { %v1138_v60 = vpop.permute.xlu0 %1137  ;;  %v1173_v6 = vrot.slane %v1165_v40, %v2504_v27  ;;  %v1180_v30 = vrot.slane %v1166_v48, %v2504_v27 }
 0x779   :  { %v1136_v8 = vpop.permute.xlu1 %1135  ;;  %v1317_v35 = vcombine.low %v1126_v29, %v1138_v60  ;;  %v1318_v52 = vcombine.high %v1126_v29, %v1138_v60 }
 0x77a   :  { %v1181_v36 = vcombine.low %v2617_v12, %v1136_v8  ;;  %v1182_v58 = vcombine.high %v2617_v12, %v1136_v8 }
 0x77b   :  { %v1325_v42 = vrot.slane %v1317_v35, %v2504_v27  ;;  %v2641_v11 = vrot.slane %v1318_v52, %v2504_v27 }
 0x77c   :  { %v1144_v31 = vpop.permute.xlu0 %1143  ;;  %v1189_v43 = vrot.slane %v1181_v36, %v2504_v27  ;;  %v1196_v60 = vrot.slane %v1182_v58, %v2504_v27 }
 0x77d   :  { %v1142_v32 = vpop.permute.xlu1 %1141  ;;  %v1365_v56 = vcombine.low %v1309_v46, %v1325_v42  ;;  %v1366_v62 = vcombine.high %v1309_v46, %v1325_v42 }
 0x77e   :  { %v1229_v0 = vcombine.low %v1173_v6, %v1189_v43  ;;  %v1230_v13 = vcombine.high %v1173_v6, %v1189_v43  ;;  %v1245_v43 = vcombine.low %v1180_v30, %v1196_v60 }
 0x77f   :  { %v1373_v20 = vrot.slane %v1365_v56, %v2526_v45  ;;  %v1380_v23 = vrot.slane %v1366_v62, %v2526_v45 }
 0x780   :  { %v1150_v33 = vpop.permute.xlu0 %1149  ;;  %v2651_v26 = vrot.slane %v1229_v0, %v2526_v45  ;;  %v1244_v35 = vrot.slane %v1230_v13, %v2526_v45 }
 0x781   :  { %v1148_v34 = vpop.permute.xlu1 %1147 }
 0x784   :  { %v1156_v39 = vpop.permute.xlu0 %1155 }
 0x785   :  { %v1154_v41 = vpop.permute.xlu1 %1153  ;;  %v1333_v44 = vcombine.low %v1144_v31, %v1156_v39  ;;  %v1334_v59 = vcombine.high %v1144_v31, %v1156_v39 }
 0x786   :  { %v1197_v50 = vcombine.low %v1142_v32, %v1154_v41  ;;  %v1198_v5 = vcombine.high %v1142_v32, %v1154_v41  ;;  %v1381_v32 = vcombine.low %v2627_v47, %v2641_v11 }
 0x787   :  { %v1341_v2 = vrot.slane %v1333_v44, %v2504_v27  ;;  %v1348_v57 = vrot.slane %v1334_v59, %v2504_v27 }
 0x788   :  { %v1162_v51 = vpop.permute.xlu0 %1161  ;;  %v1205_v3 = vrot.slane %v1197_v50, %v2504_v27  ;;  %v1212_v8 = vrot.slane %v1198_v5, %v2504_v27  ;;  %v1389_v44 = vrot.slane %v1381_v32, %v2526_v45  ;;  %v1704_v32 = vld [vmem:[%s2811_s12] sm:$0x3] }
 0x789   :  { %v1349_v53 = vcombine.low %v1150_v33, %v1162_v51  ;;  %v1350_v54 = vcombine.high %v1150_v33, %v1162_v51  ;;  %v1160_v55 = vpop.permute.xlu1 %1159 }
 0x78a   :  { %v1213_v61 = vcombine.low %v1148_v34, %v1160_v55  ;;  %v1214_v63 = vcombine.high %v1148_v34, %v1160_v55 }
 0x78b   :  { %v1357_v7 = vrot.slane %v1349_v53, %v2504_v27  ;;  %v2637_v4 = vrot.slane %v1350_v54, %v2504_v27  ;;  %v1253_v54 = vrot.slane %v1245_v43, %v2526_v45  ;;  %v2731_v43 = vsub.s32 %v2530_v49, %v2501_v22 }
 0x78c   :  { %v1221_v9 = vrot.slane %v1213_v61, %v2504_v27  ;;  %v1228_v24 = vrot.slane %v1214_v63, %v2504_v27 }
 0x78d   :  { %v1397_v15 = vcombine.low %v1341_v2, %v1357_v7  ;;  %v1398_v16 = vcombine.high %v1341_v2, %v1357_v7  ;;  %v1413_v14 = vcombine.low %v1348_v57, %v2637_v4  ;;  %v1414_v55 = vcombine.high %v1348_v57, %v2637_v4 }
 0x78e   :  { %v1261_v17 = vcombine.low %v1205_v3, %v1221_v9  ;;  %v1262_v18 = vcombine.high %v1205_v3, %v1221_v9  ;;  %v1277_v36 = vcombine.low %v1212_v8, %v1228_v24  ;;  %v1278_v56 = vcombine.high %v1212_v8, %v1228_v24 }
 0x78f   :  { %v1405_v21 = vrot.slane %v1397_v15, %v2526_v45  ;;  %v1412_v25 = vrot.slane %v1398_v16, %v2526_v45  ;;  %v1421_v27 = vrot.slane %v1413_v14, %v2526_v45  ;;  %v1382_v7 = vcombine.high %v2627_v47, %v2641_v11 }
 0x790   :  { %v2654_v1 = vrot.slane %v1261_v17, %v2526_v45  ;;  %v1276_v19 = vrot.slane %v1262_v18, %v2526_v45  ;;  %v1285_v50 = vrot.slane %v1277_v36, %v2526_v45  ;;  %v1246_v3 = vcombine.high %v1180_v30, %v1196_v60 }
 0x791   :  { %v1429_v10 = vcombine.low %v1373_v20, %v1405_v21  ;;  %v1430_v29 = vcombine.high %v1373_v20, %v1405_v21  ;;  %v1431_v12 = vcombine.low %v1380_v23, %v1412_v25  ;;  %v1432_v41 = vcombine.high %v1380_v23, %v1412_v25 }
 0x792   :  { %v1293_v31 = vcombine.low %v2651_v26, %v2654_v1  ;;  %v1295_v42 = vcombine.low %v1244_v35, %v1276_v19  ;;  %v1433_v52 = vcombine.low %v1389_v44, %v1421_v27  ;;  %v1296_v53 = vcombine.high %v1244_v35, %v1276_v19 }
 0x793   :  { %v1448_v33 = vsel %vm1437_vm4, %v1429_v10, 0.0  ;;  %v1449_v34 = vsel %vm1437_vm4, %v1430_v29, 0.0  ;;  %v1450_v39 = vsel %vm1437_vm4, %v1431_v12, 0.0  ;;  %v1451_v51 = vsel %vm1437_vm4, %v1432_v41, 0.0 }
 0x794   :  { %v1480_v37 = vsel %vm801_vm3, %v1448_v33, -inf  ;;  %v1483_v38 = vsel %vm801_vm3, %v1449_v34, -inf  ;;  %v1440_v40 = vsel %vm1437_vm4, %v1293_v31, 0.0  ;;  %v1486_v46 = vsel %vm801_vm3, %v1450_v39, -inf }
 0x795   :  { %1481 = vmax.xlane.f32.xlu0 %v1480_v37  ;;  %1484 = vmax.xlane.f32.xlu1 %v1483_v38  ;;  %v1456_v48 = vsel %vm801_vm3, %v1440_v40, -inf  ;;  %v1442_v6 = vsel %vm1437_vm4, %v1295_v42, 0.0  ;;  %v1489_v58 = vsel %vm801_vm3, %v1451_v51, -inf  ;;  %v1452_v61 = vsel %vm1437_vm4, %v1433_v52, 0.0 }
 0x796   :  { %v1462_v59 = vsel %vm801_vm3, %v1442_v6, -inf  ;;  %v1443_v62 = vsel %vm1437_vm4, %v1296_v53, 0.0  ;;  %v1434_v0 = vcombine.high %v1389_v44, %v1421_v27  ;;  %v1297_v2 = vcombine.low %v1253_v54, %v1285_v50 }
 0x797   :  { %v1492_v4 = vsel %vm801_vm3, %v1452_v61, -inf  ;;  %v1465_v63 = vsel %vm801_vm3, %v1443_v62, -inf  ;;  %v1428_v9 = vrot.slane %v1414_v55, %v2526_v45  ;;  %v1292_v13 = vrot.slane %v1278_v56, %v2526_v45 }
 0x798   :  { %v1453_v15 = vsel %vm1437_vm4, %v1434_v0, 0.0  ;;  %v1444_v16 = vsel %vm1437_vm4, %v1297_v2, 0.0  ;;  %v1294_v47 = vcombine.high %v2651_v26, %v2654_v1  ;;  %v1298_v11 = vcombine.high %v1253_v54, %v1285_v50 }
 0x799   :  { %1487 = vmax.xlane.f32.xlu1 %v1486_v46  ;;  %1457 = vmax.xlane.f32.xlu0 %v1456_v48  ;;  %v1396_v57 = vrot.slane %v1382_v7, %v2526_v45  ;;  %v1260_v5 = vrot.slane %v1246_v3, %v2526_v45  ;;  %v1495_v17 = vsel %vm801_vm3, %v1453_v15, -inf  ;;  %v1468_v18 = vsel %vm801_vm3, %v1444_v16, -inf }
 0x79a   :  { %v1441_v20 = vsel %vm1437_vm4, %v1294_v47, 0.0  ;;  %v1445_v21 = vsel %vm1437_vm4, %v1298_v11, 0.0  ;;  %v2224_v33 = vmov 0.0  }
 0x79b   :  { %v1435_v23 = vcombine.low %v1396_v57, %v1428_v9  ;;  %v1299_v25 = vcombine.low %v1260_v5, %v1292_v13  ;;  %v1459_v14 = vsel %vm801_vm3, %v1441_v20, -inf  ;;  %v1471_v24 = vsel %vm801_vm3, %v1445_v21, -inf  ;;  %1974 = vmatprep.mubr.msk.f32.mxu1 %vm2223_vm5, %v2224_v33 }
 0x79c   :  { %v1436_v1 = vcombine.high %v1396_v57, %v1428_v9  ;;  %v1300_v10 = vcombine.high %v1260_v5, %v1292_v13 }
 0x79d   :  { %1490 = vmax.xlane.f32.xlu1 %v1489_v58  ;;  %1463 = vmax.xlane.f32.xlu0 %v1462_v59  ;;  %v1454_v45 = vsel %vm1437_vm4, %v1435_v23, 0.0  ;;  %v1446_v26 = vsel %vm1437_vm4, %v1299_v25, 0.0 }
 0x79e   :  { %v1498_v29 = vsel %vm801_vm3, %v1454_v45, -inf  ;;  %v1474_v12 = vsel %vm801_vm3, %v1446_v26, -inf  ;;  %v1455_v19 = vsel %vm1437_vm4, %v1436_v1, 0.0  ;;  %v1447_v30 = vsel %vm1437_vm4, %v1300_v10, 0.0 }
 0x79f   :  { %v1501_v60 = vsel %vm801_vm3, %v1455_v19, -inf  ;;  %v1477_v8 = vsel %vm801_vm3, %v1447_v30, -inf }
 0x7a1   :  { %1493 = vmax.xlane.f32.xlu1 %v1492_v4  ;;  %1466 = vmax.xlane.f32.xlu0 %v1465_v63 }
 0x7a5   :  { %1496 = vmax.xlane.f32.xlu1 %v1495_v17  ;;  %1469 = vmax.xlane.f32.xlu0 %v1468_v18 }
 0x7a9   :  { %1460 = vmax.xlane.f32.xlu1 %v1459_v14  ;;  %1472 = vmax.xlane.f32.xlu0 %v1471_v24 }
 0x7ad   :  { %1499 = vmax.xlane.f32.xlu1 %v1498_v29  ;;  %1475 = vmax.xlane.f32.xlu0 %v1474_v12 }
 0x7b1   :  { %1502 = vmax.xlane.f32.xlu1 %v1501_v60  ;;  %1478 = vmax.xlane.f32.xlu0 %v1477_v8 }
 0x7c2   :  { %v807_v31 = vpop.xlane.xlu0 %806 }
 0x7c3   :  { %v1527_v50 = vrot.slane %v807_v31, %v2731_v43 }
 0x7c6   :  { %v828_v34 = vpop.xlane.xlu0 %827 }
 0x7c7   :  { %1707 = vperm.xlu0 %2117, %v1704_v32   ;;  %v1555_v53 = vrot.slane %v828_v34, %v2731_v43 }
 0x7c8   :  { %v804_v35 = vpop.xlane.xlu1 %803 }
 0x7c9   :  { %v1523_v46 = vrot.slane %v804_v35, %v2731_v43 }
 0x7ca   :  { %v810_v36 = vpop.xlane.xlu0 %809 }
 0x7cb   :  { %v1531_v6 = vrot.slane %v810_v36, %v2731_v43  ;;  %v1585_v54 = vsel %vm1584_vm6, %v1527_v50, %v1523_v46 }
 0x7cc   :  { %v831_v37 = vpop.xlane.xlu1 %830 }
 0x7cd   :  { %v1559_v51 = vrot.slane %v831_v37, %v2731_v43  ;;  %v1587_v2 = vsel %vm1586_vm7, %v1531_v6, %v1585_v54 }
 0x7ce   :  { %v813_v38 = vpop.xlane.xlu0 %812 }
 0x7cf   :  { %v1535_v22 = vrot.slane %v813_v38, %v2731_v43  ;;  %v1598_v61 = vsel %vm1584_vm6, %v1559_v51, %v1555_v53 }
 0x7d0   :  { %v834_v27 = vpop.xlane.xlu1 %833 }
 0x7d1   :  { %v1563_v52 = vrot.slane %v834_v27, %v2731_v43  ;;  %v1589_v63 = vsel %vm1588_vm8, %v1535_v22, %v1587_v2 }
 0x7d2   :  { %v816_v39 = vpop.xlane.xlu0 %815 }
 0x7d3   :  { %v1539_v55 = vrot.slane %v816_v39, %v2731_v43  ;;  %v1599_v7 = vsel %vm1586_vm7, %v1563_v52, %v1598_v61 }
 0x7d4   :  { %v837_v40 = vpop.xlane.xlu1 %836 }
 0x7d5   :  { %v1567_v49 = vrot.slane %v837_v40, %v2731_v43  ;;  %v1591_v15 = vsel %vm1590_vm9, %v1539_v55, %v1589_v63 }
 0x7d6   :  { %v819_v41 = vpop.xlane.xlu0 %818 }
 0x7d7   :  { %v1543_v62 = vrot.slane %v819_v41, %v2731_v43  ;;  %v1600_v9 = vsel %vm1588_vm8, %v1567_v49, %v1599_v7 }
 0x7d8   :  { %v840_v42 = vpop.xlane.xlu1 %839 }
 0x7d9   :  { %v1571_v56 = vrot.slane %v840_v42, %v2731_v43  ;;  %v1593_v11 = vsel %vm1592_vm10, %v1543_v62, %v1591_v15 }
 0x7da   :  { %v822_v44 = vpop.xlane.xlu0 %821 }
 0x7db   :  { %v1547_v3 = vrot.slane %v822_v44, %v2731_v43  ;;  %v1601_v16 = vsel %vm1590_vm9, %v1571_v56, %v1600_v9 }
 0x7dc   :  { %v843_v48 = vpop.xlane.xlu1 %842 }
 0x7dd   :  { %v1575_v0 = vrot.slane %v843_v48, %v2731_v43  ;;  %v1595_v17 = vsel %vm1594_vm11, %v1547_v3, %v1593_v11  ;;  %v1703_v3 = vld [vmem:[%s2812_s11] sm:$0x3] }
 0x7de   :  { %v825_v58 = vpop.xlane.xlu0 %824 }
 0x7df   :  { %v1551_v13 = vrot.slane %v825_v58, %v2731_v43  ;;  %v1602_v57 = vsel %vm1592_vm10, %v1575_v0, %v1601_v16 }
 0x7e0   :  { %v846_v59 = vpop.xlane.xlu1 %845 }
 0x7e1   :  { %v1579_v4 = vrot.slane %v846_v59, %v2731_v43  ;;  %v1597_v20 = vsel %vm1596_vm12, %v1551_v13, %v1595_v17 }
 0x7e3   :  { %v1603_v18 = vsel %vm1594_vm11, %v1579_v4, %v1602_v57 }
 0x7e4   :  { %v849_v47 = vpop.xlane.xlu1 %848 }
 0x7e5   :  { %v1583_v5 = vrot.slane %v849_v47, %v2731_v43 }
 0x7e7   :  { %v1604_v21 = vsel %vm1596_vm12, %v1583_v5, %v1603_v18 }
 0x7e8   :  { %v2066_v23 = vpack.c.bf16 %v1604_v21, %v1597_v20 }
 0x7ea   :  { %2067 = vmatpush3.bf16.msra.mxu1 %v2066_v23 }
 0x7eb   :  { %2068 = vmatprep.subr.bf16.mxu1 %v2222_v28 }
 0x822   :  { %v1482_v25 = vpop.xlane.xlu0 %1481  ;;  %v1485_v14 = vpop.xlane.xlu1 %1484 }
 0x823   :  { %v1658_v8 = vrot.slane %v1482_v25, %v2731_v43  ;;  %v1662_v31 = vrot.slane %v1485_v14, %v2731_v43 }
 0x825   :  { %v1694_v42 = vsel %vm1584_vm6, %v1662_v31, %v1658_v8 }
 0x826   :  { %v1458_v24 = vpop.xlane.xlu0 %1457  ;;  %v1488_v45 = vpop.xlane.xlu1 %1487 }
 0x827   :  { %v1626_v32 = vrot.slane %v1458_v24, %v2731_v43  ;;  %v1666_v33 = vrot.slane %v1488_v45, %v2731_v43 }
 0x829   :  { %v1695_v50 = vsel %vm1586_vm7, %v1666_v33, %v1694_v42 }
 0x82a   :  { %v1464_v26 = vpop.xlane.xlu0 %1463  ;;  %v1491_v1 = vpop.xlane.xlu1 %1490 }
 0x82b   :  { %v1634_v34 = vrot.slane %v1464_v26, %v2731_v43  ;;  %v1670_v35 = vrot.slane %v1491_v1, %v2731_v43 }
 0x82d   :  { %v1696_v53 = vsel %vm1588_vm8, %v1670_v35, %v1695_v50 }
 0x82e   :  { %v1467_v10 = vpop.xlane.xlu0 %1466  ;;  %v1494_v29 = vpop.xlane.xlu1 %1493 }
 0x82f   :  { %v1638_v36 = vrot.slane %v1467_v10, %v2731_v43  ;;  %v1674_v38 = vrot.slane %v1494_v29, %v2731_v43 }
 0x831   :  { %v1697_v22 = vsel %vm1590_vm9, %v1674_v38, %v1696_v53 }
 0x832   :  { %v1470_v12 = vpop.xlane.xlu0 %1469  ;;  %v1497_v19 = vpop.xlane.xlu1 %1496 }
 0x833   :  { %v1642_v27 = vrot.slane %v1470_v12, %v2731_v43  ;;  %v1678_v44 = vrot.slane %v1497_v19, %v2731_v43 }
 0x835   :  { %v1698_v56 = vsel %vm1592_vm10, %v1678_v44, %v1697_v22 }
 0x836   :  { %v1473_v30 = vpop.xlane.xlu0 %1472  ;;  %v1461_v60 = vpop.xlane.xlu1 %1460 }
 0x837   :  { %v1630_v28 = vrot.slane %v1461_v60, %v2731_v43  ;;  %v1646_v46 = vrot.slane %v1473_v30, %v2731_v43 }
 0x839   :  { %v1687_v37 = vsel %vm1584_vm6, %v1630_v28, %v1626_v32 }
 0x83a   :  { %v1688_v39 = vsel %vm1586_vm7, %v1634_v34, %v1687_v37  ;;  %v1476_v40 = vpop.xlane.xlu0 %1475  ;;  %v1500_v41 = vpop.xlane.xlu1 %1499 }
 0x83b   :  { %v1689_v48 = vsel %vm1588_vm8, %v1638_v36, %v1688_v39  ;;  %v1650_v51 = vrot.slane %v1476_v40, %v2731_v43  ;;  %v1682_v52 = vrot.slane %v1500_v41, %v2731_v43 }
 0x83c   :  { %v1690_v6 = vsel %vm1590_vm9, %v1642_v27, %v1689_v48 }
 0x83d   :  { %v1691_v54 = vsel %vm1592_vm10, %v1646_v46, %v1690_v6  ;;  %v1699_v62 = vsel %vm1594_vm11, %v1682_v52, %v1698_v56 }
 0x83e   :  { %v1479_v49 = vpop.xlane.xlu0 %1478  ;;  %v1503_v55 = vpop.xlane.xlu1 %1502  ;;  %v1692_v61 = vsel %vm1594_vm11, %v1650_v51, %v1691_v54 }
 0x83f   :  { %v1654_v58 = vrot.slane %v1479_v49, %v2731_v43  ;;  %v1686_v59 = vrot.slane %v1503_v55, %v2731_v43 }
 0x841   :  { %v1693_v0 = vsel %vm1596_vm12, %v1654_v58, %v1692_v61  ;;  %v1700_v2 = vsel %vm1596_vm12, %v1686_v59, %v1699_v62 }
 0x842   :  { %v2069_v7 = vpack.c.bf16 %v1700_v2, %v1693_v0 }
 0x844   :  { %2070 = vmatpush3.bf16.msra.mxu1 %v2069_v7 }
 0x846   :  { %v1708_v4 = vpop.permute.xlu0 %1707 }
 0x847   :  { %1975 = vmatmul.mubr.msk.f32.vlgmr.msra.gmra.mrb[6].mxu1 %vm1710_vm13, %v1703_v3 }
 0x91a   :  { %v1780_v63 = vpop.f32.mrb[6].mxu1 }
 0x91b   :  { %v1781_v43 = vadd.f32 %v1780_v63, %v1708_v4  ;;  %v1976_v9 = vpop.f32.mrb[7].mxu1 }
 0x91d   :  { %1785 = vst.msk [vmem:[%s2813_s13] sm:$0x3] %vm1784_vm14, %v1781_v43 }

</bundles_post_ra>
